<compile_context>
chip_gen: v7x
topology: tpu7x:2x2x1
jax: 0.10.0
libtpu: 0.0.40
codegen_flags: <defaults>
</compile_context>

<pallas_src>
import functools

import jax
import jax.numpy as jnp
from jax import lax
from jax.experimental import pallas as pl
from jax.experimental.pallas import tpu as pltpu

_HPAD = 8      # tiny hidden dims (5, 3, 1) zero-padded up to one sublane group
_SUBLANE = 8
_LANE = 128

_BT_CANDIDATES = (65536, 32768, 16384, 8192, 4096, 2048, 1024, 512, 256, 128)
_TK_CANDIDATES = (8192, 4096, 2048, 1024, 512, 256, 128)


def _round_up(x, m):
    return ((x + m - 1) // m) * m


# ----------------------------------------------------------------------------
# Kernel
# ----------------------------------------------------------------------------
def mlp_kernel(x_ref, w1_ref, b1_ref, w2t_ref, b2t_ref, w3_ref, b3_ref,
               o_ref, h1_acc):
    """One (batch_tile, k_tile) grid step of the 3-layer MLP."""
    k = pl.program_id(1)
    nk = pl.num_programs(1)

    @pl.when(k == 0)
    def _():
        h1_acc[...] = jnp.zeros_like(h1_acc)

    # fc1 partial product on the MXU: (bt, tk) @ (tk, 8), f32 accumulation.
    h1_acc[...] += jnp.dot(x_ref[...], w1_ref[...],
                           preferred_element_type=jnp.float32)

    @pl.when(k == nk - 1)
    def _():
        h1 = jnp.maximum(h1_acc[...] + b1_ref[...], 0.0)            # (bt, 8)

        # fc2 as an NT dot: (8, 8) x (bt, 8)^T -> (8, bt).  Computes the 5->3
        # layer AND moves the batch into the lane dimension, so the fc3
        # reduction and the output store are lane-dense.
        # TODO(synk): on v5e, audit the implied XLU transpose of h1 (vxpose
        # bundle counts at large bt / small F); if it binds, switch to
        # h1 @ w2p on the MXU and transpose only the final (bt, 1) column.
        h2t = lax.dot_general(
            w2t_ref[...], h1,
            dimension_numbers=(((1,), (1,)), ((), ())),
            preferred_element_type=jnp.float32)
        h2t = jnp.maximum(h2t + b2t_ref[...], 0.0)                  # (8, bt)

        # fc3 (3 -> 1) on the VPU/XLU: broadcast-multiply by the weight column
        # and reduce the (zero-padded) hidden sublanes.  No MXU pass for N=1.
        zt = jnp.sum(w3_ref[...] * h2t, axis=0, keepdims=True) + b3_ref[...]
        o_ref[...] = jax.nn.sigmoid(zt)                             # (1, bt)


# ----------------------------------------------------------------------------
# One-time parameter preparation (hoisted out of the per-call wrapper)
# ----------------------------------------------------------------------------
def prepare_params(params, *, fc1_dtype=jnp.float32):
    """Pad the tiny hidden dims to 8 and pre-transpose fc2 — do this ONCE.

    The padded columns/rows are exactly zero, ReLU keeps them zero, and they
    contribute nothing to the final reduction, so semantics are unchanged.
    `fc1_dtype` lets a producer that streams bf16 activations also keep the
    fc1 weights in bf16 (f32 accumulation happens in-kernel).
    """
    w1, b1 = params["w1"], params["b1"]
    w2, b2 = params["w2"], params["b2"]
    w3, b3 = params["w3"], params["b3"]
    H1, H2 = w1.shape[1], w2.shape[1]                                # 5, 3
    f32 = jnp.float32

    w1p = jnp.pad(jnp.asarray(w1, f32), ((0, 0), (0, _HPAD - H1)))   # (F, 8)
    w1p = w1p.astype(fc1_dtype)
    b1p = jnp.pad(jnp.asarray(b1, f32).reshape(1, H1),
                  ((0, 0), (0, _HPAD - H1)))                         # (1, 8)
    w2t = jnp.pad(jnp.asarray(w2, f32).T,
                  ((0, _HPAD - H2), (0, _HPAD - H1)))                # (8, 8)
    b2t = jnp.pad(jnp.asarray(b2, f32).reshape(H2, 1),
                  ((0, _HPAD - H2), (0, 0)))                         # (8, 1)
    w3p = jnp.pad(jnp.asarray(w3, f32), ((0, _HPAD - H2), (0, 0)))   # (8, 1)
    b3p = jnp.asarray(b3, f32).reshape(1, 1)                         # (1, 1)
    return dict(w1p=w1p, b1p=b1p, w2t=w2t, b2t=b2t, w3p=w3p, b3p=b3p)


# ----------------------------------------------------------------------------
# Generation-aware VMEM budget and tile selection
# ----------------------------------------------------------------------------
@functools.lru_cache(maxsize=1)
def _tpu_config():
    """Return (vmem_budget_bytes, vmem_limit_bytes, num_tensorcores)."""
    try:
        vmem_cap = int(pltpu.get_tpu_info().vmem_capacity_bytes)
    except Exception:
        # Unknown backend (interpret mode, query unavailable): conservative.
        return 24 * 1024 * 1024, 32 * 1024 * 1024, 1
    if vmem_cap <= 64 * 1024 * 1024:
        # v7x-class: 64 MiB physical VMEM per TC, 2 TensorCores per chip —
        # leave headroom for Mosaic internal scratch.
        return 36 * 1024 * 1024, 44 * 1024 * 1024, 2
    # v5e / v6e-class: 128 MiB physical VMEM, 1 TensorCore per chip.
    return 48 * 1024 * 1024, 64 * 1024 * 1024, 1


def _block_vmem_bytes(bt, tk, n_k, x_itemsize):
    """Scoped-VMEM estimate for one grid step, including lane/sublane padding."""
    # Streamed x tile, double-buffered; lane (last) dim pads to 128.
    x_bytes = 2 * _round_up(bt, _SUBLANE) * _round_up(tk, _LANE) * x_itemsize
    # w1 block (tk, 8): 8 lanes pad to 128; single buffer when K is untiled
    # (constant block index -> pl.Buffered(1)), double-buffered otherwise.
    w1_bufs = 1 if n_k == 1 else 2
    w1_bytes = w1_bufs * _round_up(tk, _SUBLANE) * _LANE * x_itemsize
    # Output block (1, bt): 1 sublane pads to 8; double-buffered.
    out_bytes = 2 * _SUBLANE * _round_up(bt, _LANE) * 4
    # h1 accumulator scratch (bt, 8) f32: 8 lanes pad to 128.
    h1_bytes = _round_up(bt, _SUBLANE) * _LANE * 4
    # Tiny constant weights/biases (single-buffered), ~one vreg tile each.
    const_bytes = 5 * _SUBLANE * _LANE * 4
    return x_bytes + w1_bytes + out_bytes + h1_bytes + const_bytes


def _pick_tiling(B, F, x_itemsize, vmem_budget_bytes, *, num_tensorcores):
    """Choose (batch_tile, k_tile)."""
    bt_cands = [B] + [c for c in _BT_CANDIDATES if c < B and B % c == 0]
    tk_cands = [F] + [c for c in _TK_CANDIDATES if c < F and F % c == 0]

    # Prefer no K split; K-tile only when it is what keeps bt >= ~512 rows
    # (the big DMA-efficiency lever) within the VMEM budget.
    MIN_GOOD_BT = 512
    chosen = None
    for tk in tk_cands:
        n_k = F // tk
        bt = next((c for c in bt_cands
                   if _block_vmem_bytes(c, tk, n_k, x_itemsize)
                   <= vmem_budget_bytes), None)
        if bt is None:
            continue
        if chosen is None:
            chosen = (bt, tk)
        if bt >= min(MIN_GOOD_BT, B):
            chosen = (bt, tk)
            break
    if chosen is None:
        # Nothing fits the budget even at the smallest legal tiles: take the
        # smallest tiling and rely on the raised scoped-VMEM limit.
        chosen = (bt_cands[-1], tk_cands[-1])
    bt, tk = chosen

    # Batch-split policy: only split when there is enough streamed data to
    # amortize the ~0.35us/step overhead (>= ~512 KiB of x per step, >= 1 MiB
    # total), and — when relying on the "parallel" axis to shard over v7x's
    # 2 TensorCores — only when that yields >= 2 steps per core.
    MIN_STEP_X_BYTES = 512 * 1024
    min_steps = 2 * max(1, num_tensorcores)
    total_x_bytes = B * F * x_itemsize
    if bt == B and total_x_bytes >= max(1 << 20, min_steps * MIN_STEP_X_BYTES):
        for c in bt_cands:
            if c >= B:
                continue
            if (B // c) >= min_steps and c * F * x_itemsize >= MIN_STEP_X_BYTES:
                bt = c
                break
    return bt, tk


# ----------------------------------------------------------------------------
# Forward wrapper
# ----------------------------------------------------------------------------
def net_forward(x, params, *, batch_tile=None, k_tile=None,
                vmem_budget_bytes=None, vmem_limit_bytes=None):
    """Pallas implementation of Net.forward.

    x: (B, n_features), f32 or bf16 (bf16 must come from the producer — no
       wrapper-side cast, which would add a full extra HBM pass over x).
    params: either raw params (w1..b3, as in the reference) or the output of
       prepare_params(); prefer preparing once and reusing.
    """
    B, F = x.shape
    prepped = params if "w1p" in params else prepare_params(params,
                                                            fc1_dtype=x.dtype)
    w1p, b1p = prepped["w1p"], prepped["b1p"]
    w2t, b2t = prepped["w2t"], prepped["b2t"]
    w3p, b3p = prepped["w3p"], prepped["b3p"]
    assert w1p.shape == (F, _HPAD)

    budget, limit, num_tcs = _tpu_config()
    if vmem_budget_bytes is not None:
        budget = vmem_budget_bytes
    if vmem_limit_bytes is not None:
        limit = vmem_limit_bytes

    x_itemsize = jnp.dtype(x.dtype).itemsize
    auto_bt, auto_tk = _pick_tiling(B, F, x_itemsize, budget,
                                    num_tensorcores=num_tcs)
    bt = batch_tile if batch_tile is not None else auto_bt
    tk = k_tile if k_tile is not None else auto_tk

    # Lane-divisibility guards for user-supplied tiles: the output block is
    # (1, bt) with batch in the lane axis, and the x block is (bt, tk).
    if not (bt == B or (bt % _LANE == 0 and B % bt == 0)):
        raise ValueError(
            f"batch_tile={bt} must equal B={B} or be a multiple of 128 dividing B")
    if not (tk == F or (tk % _LANE == 0 and F % tk == 0)):
        raise ValueError(
            f"k_tile={tk} must equal n_features={F} or be a multiple of 128 dividing it")

    n_bt, n_k = B // bt, F // tk
    grid = (n_bt, n_k)

    single = pl.Buffered(1)   # block index never changes: one pipeline buffer

    def const_spec(shape):
        return pl.BlockSpec(shape, lambda i, k: (0,) * len(shape),
                            pipeline_mode=single)

    if n_k == 1:
        w1_spec = pl.BlockSpec((tk, _HPAD), lambda i, k: (k, 0),
                               pipeline_mode=single)
    else:
        w1_spec = pl.BlockSpec((tk, _HPAD), lambda i, k: (k, 0))

    out = pl.pallas_call(
        mlp_kernel,
        out_shape=jax.ShapeDtypeStruct((1, B), jnp.float32),   # lane-dense out
        grid_spec=pltpu.PrefetchScalarGridSpec(
            num_scalar_prefetch=0,
            grid=grid,
            in_specs=[
                pl.BlockSpec((bt, tk), lambda i, k: (i, k)),    # streamed x
                w1_spec,
                const_spec(b1p.shape),
                const_spec(w2t.shape),
                const_spec(b2t.shape),
                const_spec(w3p.shape),
                const_spec(b3p.shape),
            ],
            out_specs=pl.BlockSpec((1, bt), lambda i, k: (0, i)),
            scratch_shapes=[pltpu.VMEM((bt, _HPAD), jnp.float32)],
        ),
        compiler_params=pltpu.CompilerParams(
            dimension_semantics=("parallel", "arbitrary"),
            vmem_limit_bytes=limit,
        ),
    )(x, w1p, b1p, w2t, b2t, w3p, b3p)

    return out.reshape(B, 1)


# ----------------------------------------------------------------------------
# Reference / init / test
# ----------------------------------------------------------------------------
def init_params(key, n_features):
    """Deterministic init mimicking nn.Linear's uniform(-1/sqrt(fan_in), +)."""
    def linear(key, fan_in, fan_out):
        kw, kb = jax.random.split(key)
        bound = 1.0 / jnp.sqrt(fan_in)
        w = jax.random.uniform(kw, (fan_in, fan_out), jnp.float32, -bound, bound)
        b = jax.random.uniform(kb, (1, fan_out), jnp.float32, -bound, bound)
        return w, b

    k1, k2, k3 = jax.random.split(key, 3)
    w1, b1 = linear(k1, n_features, 5)
    w2, b2 = linear(k2, 5, 3)
    w3, b3 = linear(k3, 3, 1)
    return dict(w1=w1, b1=b1, w2=w2, b2=b2, w3=w3, b3=b3)


def net_reference(x, p):
    h1 = jnp.maximum(x @ p["w1"] + p["b1"], 0.0)
    h2 = jnp.maximum(h1 @ p["w2"] + p["b2"], 0.0)
    return jax.nn.sigmoid(h2 @ p["w3"] + p["b3"])


if __name__ == "__main__":
    key = jax.random.PRNGKey(0)
    kx, kp = jax.random.split(key)

    batch, n_features = 512, 32
    x = jax.random.normal(kx, (batch, n_features), jnp.float32)
    params = init_params(kp, n_features)

    # One-time weight prep (padding / transpose) hoisted out of the forward.
    prepped = prepare_params(params)

    out = jax.block_until_ready(net_forward(x, prepped))
    ref = net_reference(x, params)
    assert out.shape == (batch, 1)
    assert jnp.allclose(out, ref, atol=1e-4, rtol=1e-4)

    # bf16 path: the *producer* supplies bf16 activations and fc1 weights are
    # prepped once in bf16 — no per-call wrapper-side cast of the x stream.
    x_bf16 = x.astype(jnp.bfloat16)
    prepped_bf16 = prepare_params(params, fc1_dtype=jnp.bfloat16)
    out_bf16 = jax.block_until_ready(net_forward(x_bf16, prepped_bf16))
    assert jnp.allclose(out_bf16, ref, atol=3e-2, rtol=3e-2)

    print("KERNEL_OK")
</pallas_src>

<mosaic_0001>
module attributes {stable_mosaic.version = 11 : i64} {
  func.func @mlp_kernel(%arg0: i32, %arg1: i32, %arg2: memref<512x32xf32, #tpu.memory_space<vmem>>, %arg3: memref<32x8xf32, #tpu.memory_space<vmem>>, %arg4: memref<1x8xf32, #tpu.memory_space<vmem>>, %arg5: memref<8x8xf32, #tpu.memory_space<vmem>>, %arg6: memref<8x1xf32, #tpu.memory_space<vmem>>, %arg7: memref<8x1xf32, #tpu.memory_space<vmem>>, %arg8: memref<1x1xf32, #tpu.memory_space<vmem>>, %arg9: memref<1x512xf32, #tpu.memory_space<vmem>>, %arg10: memref<512x8xf32, #tpu.memory_space<vmem>>) attributes {dimension_semantics = [#tpu.dimension_semantics<parallel>, #tpu.dimension_semantics<arbitrary>], iteration_bounds = array<i64: 1, 1>, scalar_prefetch = 0 : i64, scratch_operands = 1 : i64, tpu.core_type = #tpu.core_type<tc>, window_params = [{transform_indices = @transform_0, window_bounds = array<i64: 512, 32>}, {pipeline_mode = #tpu.pipeline_mode<synchronous>, transform_indices = @transform_1, window_bounds = array<i64: 32, 8>}, {pipeline_mode = #tpu.pipeline_mode<synchronous>, transform_indices = @transform_2, window_bounds = array<i64: 1, 8>}, {pipeline_mode = #tpu.pipeline_mode<synchronous>, transform_indices = @transform_3, window_bounds = array<i64: 8, 8>}, {pipeline_mode = #tpu.pipeline_mode<synchronous>, transform_indices = @transform_4, window_bounds = array<i64: 8, 1>}, {pipeline_mode = #tpu.pipeline_mode<synchronous>, transform_indices = @transform_5, window_bounds = array<i64: 8, 1>}, {pipeline_mode = #tpu.pipeline_mode<synchronous>, transform_indices = @transform_6, window_bounds = array<i64: 1, 1>}, {transform_indices = @transform_7, window_bounds = array<i64: 1, 512>}]} {
    %c0_i32 = arith.constant 0 : i32
    %0 = arith.cmpi eq, %arg1, %c0_i32 : i32
    %1 = arith.extui %0 : i1 to i32
    %c0_i32_0 = arith.constant 0 : i32
    %2 = arith.cmpi ne, %1, %c0_i32_0 : i32
    scf.if %2 {
      %cst_10 = arith.constant 0.000000e+00 : f32
      %12 = vector.broadcast %cst_10 : f32 to vector<512x8xf32>
      %c0_11 = arith.constant 0 : index
      %c0_12 = arith.constant 0 : index
      %13 = vector.load %arg10[%c0_11, %c0_12] : memref<512x8xf32, #tpu.memory_space<vmem>>, vector<512x8xf32>
      tpu.vector_store %arg10[%c0_11, %c0_12], %12 {strides = array<i32>} : memref<512x8xf32, #tpu.memory_space<vmem>>, vector<512x8xf32>,
    } else {
    }
    %c0 = arith.constant 0 : index
    %c0_1 = arith.constant 0 : index
    %3 = vector.load %arg10[%c0, %c0_1] : memref<512x8xf32, #tpu.memory_space<vmem>>, vector<512x8xf32>
    %c0_2 = arith.constant 0 : index
    %c0_3 = arith.constant 0 : index
    %4 = vector.load %arg2[%c0_2, %c0_3] : memref<512x32xf32, #tpu.memory_space<vmem>>, vector<512x32xf32>
    %c0_4 = arith.constant 0 : index
    %c0_5 = arith.constant 0 : index
    %5 = vector.load %arg3[%c0_4, %c0_5] : memref<32x8xf32, #tpu.memory_space<vmem>>, vector<32x8xf32>
    %cst = arith.constant dense<0.000000e+00> : vector<512x8xf32>
    %6 = tpu.matmul %4, %5, %cst {dimension_numbers = #tpu.dot_dimension_numbers<[1], [0], [0], [1], [0, 0, 1, 1], [], []>} : vector<512x32xf32>, vector<32x8xf32>, vector<512x8xf32> -> vector<512x8xf32>
    %7 = arith.addf %3, %6 : vector<512x8xf32>
    %c0_6 = arith.constant 0 : index
    %c0_7 = arith.constant 0 : index
    %8 = vector.load %arg10[%c0_6, %c0_7] : memref<512x8xf32, #tpu.memory_space<vmem>>, vector<512x8xf32>
    tpu.vector_store %arg10[%c0_6, %c0_7], %7 {strides = array<i32>} : memref<512x8xf32, #tpu.memory_space<vmem>>, vector<512x8xf32>,
    %c0_i32_8 = arith.constant 0 : i32
    %9 = arith.cmpi eq, %arg1, %c0_i32_8 : i32
    %10 = arith.extui %9 : i1 to i32
    %c0_i32_9 = arith.constant 0 : i32
    %11 = arith.cmpi ne, %10, %c0_i32_9 : i32
    scf.if %11 {
      %c0_10 = arith.constant 0 : index
      %c0_11 = arith.constant 0 : index
      %12 = vector.load %arg10[%c0_10, %c0_11] : memref<512x8xf32, #tpu.memory_space<vmem>>, vector<512x8xf32>
      %c0_12 = arith.constant 0 : index
      %c0_13 = arith.constant 0 : index
      %13 = vector.load %arg4[%c0_12, %c0_13] : memref<1x8xf32, #tpu.memory_space<vmem>>, vector<1x8xf32>
      %14 = vector.broadcast %13 : vector<1x8xf32> to vector<512x8xf32>
      %15 = arith.addf %12, %14 : vector<512x8xf32>
      %cst_14 = arith.constant 0.000000e+00 : f32
      %16 = vector.broadcast %cst_14 : f32 to vector<512x8xf32>
      %17 = arith.maximumf %15, %16 : vector<512x8xf32>
      %c0_15 = arith.constant 0 : index
      %c0_16 = arith.constant 0 : index
      %18 = vector.load %arg5[%c0_15, %c0_16] : memref<8x8xf32, #tpu.memory_space<vmem>>, vector<8x8xf32>
      %cst_17 = arith.constant dense<0.000000e+00> : vector<8x512xf32>
      %19 = tpu.matmul %18, %17, %cst_17 {dimension_numbers = #tpu.dot_dimension_numbers<[1], [1], [0], [0], [0, 0, 1, 0], [], []>} : vector<8x8xf32>, vector<512x8xf32>, vector<8x512xf32> -> vector<8x512xf32>
      %c0_18 = arith.constant 0 : index
      %c0_19 = arith.constant 0 : index
      %20 = vector.load %arg6[%c0_18, %c0_19] : memref<8x1xf32, #tpu.memory_space<vmem>>, vector<8x1xf32>
      %21 = vector.broadcast %20 : vector<8x1xf32> to vector<8x512xf32>
      %22 = arith.addf %19, %21 : vector<8x512xf32>
      %cst_20 = arith.constant 0.000000e+00 : f32
      %23 = vector.broadcast %cst_20 : f32 to vector<8x512xf32>
      %24 = arith.maximumf %22, %23 : vector<8x512xf32>
      %c0_21 = arith.constant 0 : index
      %c0_22 = arith.constant 0 : index
      %25 = vector.load %arg7[%c0_21, %c0_22] : memref<8x1xf32, #tpu.memory_space<vmem>>, vector<8x1xf32>
      %26 = vector.broadcast %25 : vector<8x1xf32> to vector<8x512xf32>
      %27 = arith.mulf %26, %24 : vector<8x512xf32>
      %cst_23 = arith.constant dense<0.000000e+00> : vector<512xf32>
      %28 = vector.multi_reduction <add>, %27, %cst_23 [0] : vector<8x512xf32> to vector<512xf32>
      %29 = vector.shape_cast %28 : vector<512xf32> to vector<1x512xf32>
      %c0_24 = arith.constant 0 : index
      %c0_25 = arith.constant 0 : index
      %30 = vector.load %arg8[%c0_24, %c0_25] : memref<1x1xf32, #tpu.memory_space<vmem>>, vector<1x1xf32>
      %31 = vector.broadcast %30 : vector<1x1xf32> to vector<1x512xf32>
      %32 = arith.addf %29, %31 : vector<1x512xf32>
      %33 = arith.negf %32 : vector<1x512xf32>
      %34 = math.exp %33 : vector<1x512xf32>
      %cst_26 = arith.constant 1.000000e+00 : f32
      %35 = vector.broadcast %cst_26 : f32 to vector<1x512xf32>
      %36 = arith.addf %35, %34 : vector<1x512xf32>
      %37 = arith.divf %35, %36 : vector<1x512xf32>
      %c0_27 = arith.constant 0 : index
      %c0_28 = arith.constant 0 : index
      %38 = vector.load %arg9[%c0_27, %c0_28] : memref<1x512xf32, #tpu.memory_space<vmem>>, vector<1x512xf32>
      tpu.vector_store %arg9[%c0_27, %c0_28], %37 {strides = array<i32>} : memref<1x512xf32, #tpu.memory_space<vmem>>, vector<1x512xf32>,
    } else {
    }
    return
  }
  func.func @transform_0(%arg0: i32, %arg1: i32) -> (i32, i32) {
    %c0_i32 = arith.constant 0 : i32
    return %arg0, %arg1 : i32, i32
  }
  func.func @transform_1(%arg0: i32, %arg1: i32) -> (i32, i32) {
    %c0_i32 = arith.constant 0 : i32
    %c0_i32_0 = arith.constant 0 : i32
    return %arg1, %c0_i32 : i32, i32
  }
  func.func @transform_2(%arg0: i32, %arg1: i32) -> (i32, i32) {
    %c0_i32 = arith.constant 0 : i32
    %c0_i32_0 = arith.constant 0 : i32
    %c0_i32_1 = arith.constant 0 : i32
    return %c0_i32, %c0_i32_0 : i32, i32
  }
  func.func @transform_3(%arg0: i32, %arg1: i32) -> (i32, i32) {
    %c0_i32 = arith.constant 0 : i32
    %c0_i32_0 = arith.constant 0 : i32
    %c0_i32_1 = arith.constant 0 : i32
    return %c0_i32, %c0_i32_0 : i32, i32
  }
  func.func @transform_4(%arg0: i32, %arg1: i32) -> (i32, i32) {
    %c0_i32 = arith.constant 0 : i32
    %c0_i32_0 = arith.constant 0 : i32
    %c0_i32_1 = arith.constant 0 : i32
    return %c0_i32, %c0_i32_0 : i32, i32
  }
  func.func @transform_5(%arg0: i32, %arg1: i32) -> (i32, i32) {
    %c0_i32 = arith.constant 0 : i32
    %c0_i32_0 = arith.constant 0 : i32
    %c0_i32_1 = arith.constant 0 : i32
    return %c0_i32, %c0_i32_0 : i32, i32
  }
  func.func @transform_6(%arg0: i32, %arg1: i32) -> (i32, i32) {
    %c0_i32 = arith.constant 0 : i32
    %c0_i32_0 = arith.constant 0 : i32
    %c0_i32_1 = arith.constant 0 : i32
    return %c0_i32, %c0_i32_0 : i32, i32
  }
  func.func @transform_7(%arg0: i32, %arg1: i32) -> (i32, i32) {
    %c0_i32 = arith.constant 0 : i32
    %c0_i32_0 = arith.constant 0 : i32
    return %c0_i32, %arg0 : i32, i32
  }
}

</mosaic_0001>

<bundles_post_ra>
// kernel: tpu_custom_call.1
= control target key start
LH: loop header
LB: loop body
LE: loop exit
PB: predicated region body
PF: predicated region fallthrough
CT: control target
= control target key end

     0   :  { %s2821_s0 = inlined_call_operand.vmem [shape: f32[512,32], index: 0, kind: input, shape index: {}]   ;;  %s2822_s1 = inlined_call_operand.vmem [shape: f32[32,8], index: 1, kind: input, shape index: {}]   ;;  %s2823_s2 = inlined_call_operand.vmem [shape: f32[1,8], index: 2, kind: input, shape index: {}]   ;;  %s2824_s3 = inlined_call_operand.vmem [shape: f32[8,8], index: 3, kind: input, shape index: {}]   ;;  %s2825_s4 = inlined_call_operand.vmem [shape: f32[8,1], index: 4, kind: input, shape index: {}]   ;;  %s2826_s5 = inlined_call_operand.vmem [shape: f32[8,1], index: 5, kind: input, shape index: {}]   ;;  %s2827_s6 = inlined_call_operand.<no memory space> [shape: f32[1,1], index: 6, kind: input, shape index: {}]   ;;  %s2828_s7 = inlined_call_operand.hbm [shape: f32[1,512], index: 7, kind: output, shape index: {}]  }
   0x1   :  { %v12_v0 = vstv %s2827_s6 }
   0x2   :  { %13 = vst [vmem:[#allocation3] sm:$0x1] %v12_v0 }
   0x3   :  { %v226_v1 = vld [vmem:[%s2822_s1] sm:$0xff]  ;;  %v227_v2 = vld [vmem:[%s2822_s1 + $0x8] sm:$0xff]  ;;  %v228_v3 = vld [vmem:[%s2822_s1 + $0x10] sm:$0xff]  ;;  %vm230_vm0 = vcmask 261120   ;;  %vm33_vm1 = vcmask 64512   ;;  %v2133_v9 = vmov 0.0  }
   0x4   :  { %v1982_v4 = vpack.c.bf16 %v227_v2, %v226_v1  ;;  %v229_v5 = vld [vmem:[%s2822_s1 + $0x18] sm:$0xff]  ;;  %v162_v6 = vld [vmem:[%s2821_s0] sm:$0xff]  ;;  %v2199_v8 = vld [vmem:[%s2821_s0 + $0x8] sm:$0xff]  ;;  %35 = vst.msk [vmem:[#allocation2 + $0x8] sm:$0xff] %vm33_vm1, %v2133_v9 }
   0x5   :  { %v1986_v7 = vpack.c.bf16 %v229_v5, %v228_v3  ;;  %1886 = vmatprep.mubr.msk.f32.mxu0 %vm230_vm0, %v162_v6  ;;  %34 = vst.msk [vmem:[#allocation2] sm:$0xff] %vm33_vm1, %v2133_v9  ;;  %36 = vst.msk [vmem:[#allocation2 + $0x10] sm:$0xff] %vm33_vm1, %v2133_v9  ;;  %v164_v10 = vld [vmem:[%s2821_s0 + $0x10] sm:$0xff]  ;;  %v165_v11 = vld [vmem:[%s2821_s0 + $0x18] sm:$0xff] }
   0x6   :  { %1983 = vmatprep.subr.bf16.mxu0 %v1982_v4  ;;  %37 = vst.msk [vmem:[#allocation2 + $0x18] sm:$0xff] %vm33_vm1, %v2133_v9  ;;  %38 = vst.msk [vmem:[#allocation2 + $0x20] sm:$0xff] %vm33_vm1, %v2133_v9  ;;  %v166_v12 = vld [vmem:[%s2821_s0 + $0x20] sm:$0xff]  ;;  %v167_v13 = vld [vmem:[%s2821_s0 + $0x28] sm:$0xff] }
   0x7   :  { %1985 = vmatpush3.bf16.msra.mxu0 %v1982_v4  ;;  %39 = vst.msk [vmem:[#allocation2 + $0x28] sm:$0xff] %vm33_vm1, %v2133_v9  ;;  %40 = vst.msk [vmem:[#allocation2 + $0x30] sm:$0xff] %vm33_vm1, %v2133_v9  ;;  %v168_v14 = vld [vmem:[%s2821_s0 + $0x30] sm:$0xff]  ;;  %v169_v15 = vld [vmem:[%s2821_s0 + $0x38] sm:$0xff] }
   0x8   :  { %1987 = vmatprep.subr.bf16.mxu0 %v1986_v7  ;;  %41 = vst.msk [vmem:[#allocation2 + $0x38] sm:$0xff] %vm33_vm1, %v2133_v9  ;;  %42 = vst.msk [vmem:[#allocation2 + $0x40] sm:$0xff] %vm33_vm1, %v2133_v9  ;;  %v170_v16 = vld [vmem:[%s2821_s0 + $0x40] sm:$0xff] }
   0x9   :  { %43 = vst.msk [vmem:[#allocation2 + $0x48] sm:$0xff] %vm33_vm1, %v2133_v9  ;;  %44 = vst.msk [vmem:[#allocation2 + $0x50] sm:$0xff] %vm33_vm1, %v2133_v9 }
   0xa   :  { %45 = vst.msk [vmem:[#allocation2 + $0x58] sm:$0xff] %vm33_vm1, %v2133_v9  ;;  %46 = vst.msk [vmem:[#allocation2 + $0x60] sm:$0xff] %vm33_vm1, %v2133_v9 }
   0xb   :  { %1989 = vmatpush3.bf16.msra.mxu0 %v1986_v7  ;;  %47 = vst.msk [vmem:[#allocation2 + $0x68] sm:$0xff] %vm33_vm1, %v2133_v9  ;;  %48 = vst.msk [vmem:[#allocation2 + $0x70] sm:$0xff] %vm33_vm1, %v2133_v9 }
   0xc   :  { %49 = vst.msk [vmem:[#allocation2 + $0x78] sm:$0xff] %vm33_vm1, %v2133_v9  ;;  %50 = vst.msk [vmem:[#allocation2 + $0x80] sm:$0xff] %vm33_vm1, %v2133_v9 }
   0xd   :  { %51 = vst.msk [vmem:[#allocation2 + $0x88] sm:$0xff] %vm33_vm1, %v2133_v9  ;;  %52 = vst.msk [vmem:[#allocation2 + $0x90] sm:$0xff] %vm33_vm1, %v2133_v9 }
   0xe   :  { %53 = vst.msk [vmem:[#allocation2 + $0x98] sm:$0xff] %vm33_vm1, %v2133_v9  ;;  %54 = vst.msk [vmem:[#allocation2 + $0xa0] sm:$0xff] %vm33_vm1, %v2133_v9  ;;  %1887 = vmatmul.mubr.msk.f32.vlgmr.msra.gmra.mrb[0].mxu0 %vm230_vm0, %v2199_v8 }
   0xf   :  { %55 = vst.msk [vmem:[#allocation2 + $0xa8] sm:$0xff] %vm33_vm1, %v2133_v9  ;;  %56 = vst.msk [vmem:[#allocation2 + $0xb0] sm:$0xff] %vm33_vm1, %v2133_v9  ;;  %1889 = vmatprep.mubr.msk.f32.mxu0 %vm230_vm0, %v164_v10 }
  0x10   :  { %57 = vst.msk [vmem:[#allocation2 + $0xb8] sm:$0xff] %vm33_vm1, %v2133_v9  ;;  %58 = vst.msk [vmem:[#allocation2 + $0xc0] sm:$0xff] %vm33_vm1, %v2133_v9 }
  0x11   :  { %59 = vst.msk [vmem:[#allocation2 + $0xc8] sm:$0xff] %vm33_vm1, %v2133_v9  ;;  %60 = vst.msk [vmem:[#allocation2 + $0xd0] sm:$0xff] %vm33_vm1, %v2133_v9 }
  0x12   :  { %61 = vst.msk [vmem:[#allocation2 + $0xd8] sm:$0xff] %vm33_vm1, %v2133_v9  ;;  %62 = vst.msk [vmem:[#allocation2 + $0xe0] sm:$0xff] %vm33_vm1, %v2133_v9  ;;  %1890 = vmatmul.mubr.msk.f32.gmra.mrb[2].mxu0 %vm230_vm0, %v165_v11 }
  0x13   :  { %63 = vst.msk [vmem:[#allocation2 + $0xe8] sm:$0xff] %vm33_vm1, %v2133_v9  ;;  %64 = vst.msk [vmem:[#allocation2 + $0xf0] sm:$0xff] %vm33_vm1, %v2133_v9  ;;  %1892 = vmatprep.mubr.msk.f32.mxu0 %vm230_vm0, %v166_v12 }
  0x14   :  { %65 = vst.msk [vmem:[#allocation2 + $0xf8] sm:$0xff] %vm33_vm1, %v2133_v9  ;;  %66 = vst.msk [vmem:[#allocation2 + $0x100] sm:$0xff] %vm33_vm1, %v2133_v9 }
  0x15   :  { %67 = vst.msk [vmem:[#allocation2 + $0x108] sm:$0xff] %vm33_vm1, %v2133_v9  ;;  %68 = vst.msk [vmem:[#allocation2 + $0x110] sm:$0xff] %vm33_vm1, %v2133_v9 }
  0x16   :  { %69 = vst.msk [vmem:[#allocation2 + $0x118] sm:$0xff] %vm33_vm1, %v2133_v9  ;;  %70 = vst.msk [vmem:[#allocation2 + $0x120] sm:$0xff] %vm33_vm1, %v2133_v9  ;;  %1893 = vmatmul.mubr.msk.f32.gmra.mrb[4].mxu0 %vm230_vm0, %v167_v13 }
  0x17   :  { %71 = vst.msk [vmem:[#allocation2 + $0x128] sm:$0xff] %vm33_vm1, %v2133_v9  ;;  %72 = vst.msk [vmem:[#allocation2 + $0x130] sm:$0xff] %vm33_vm1, %v2133_v9  ;;  %1895 = vmatprep.mubr.msk.f32.mxu0 %vm230_vm0, %v168_v14 }
  0x18   :  { %73 = vst.msk [vmem:[#allocation2 + $0x138] sm:$0xff] %vm33_vm1, %v2133_v9  ;;  %74 = vst.msk [vmem:[#allocation2 + $0x140] sm:$0xff] %vm33_vm1, %v2133_v9 }
  0x19   :  { %75 = vst.msk [vmem:[#allocation2 + $0x148] sm:$0xff] %vm33_vm1, %v2133_v9  ;;  %76 = vst.msk [vmem:[#allocation2 + $0x150] sm:$0xff] %vm33_vm1, %v2133_v9 }
  0x1a   :  { %77 = vst.msk [vmem:[#allocation2 + $0x158] sm:$0xff] %vm33_vm1, %v2133_v9  ;;  %78 = vst.msk [vmem:[#allocation2 + $0x160] sm:$0xff] %vm33_vm1, %v2133_v9  ;;  %1896 = vmatmul.mubr.msk.f32.gmra.mrb[6].mxu0 %vm230_vm0, %v169_v15 }
  0x1b   :  { %79 = vst.msk [vmem:[#allocation2 + $0x168] sm:$0xff] %vm33_vm1, %v2133_v9  ;;  %80 = vst.msk [vmem:[#allocation2 + $0x170] sm:$0xff] %vm33_vm1, %v2133_v9 }
  0x1c   :  { %81 = vst.msk [vmem:[#allocation2 + $0x178] sm:$0xff] %vm33_vm1, %v2133_v9  ;;  %82 = vst.msk [vmem:[#allocation2 + $0x180] sm:$0xff] %vm33_vm1, %v2133_v9 }
  0x1d   :  { %83 = vst.msk [vmem:[#allocation2 + $0x188] sm:$0xff] %vm33_vm1, %v2133_v9  ;;  %84 = vst.msk [vmem:[#allocation2 + $0x190] sm:$0xff] %vm33_vm1, %v2133_v9 }
  0x1e   :  { %85 = vst.msk [vmem:[#allocation2 + $0x198] sm:$0xff] %vm33_vm1, %v2133_v9  ;;  %86 = vst.msk [vmem:[#allocation2 + $0x1a0] sm:$0xff] %vm33_vm1, %v2133_v9 }
  0x1f   :  { %87 = vst.msk [vmem:[#allocation2 + $0x1a8] sm:$0xff] %vm33_vm1, %v2133_v9  ;;  %88 = vst.msk [vmem:[#allocation2 + $0x1b0] sm:$0xff] %vm33_vm1, %v2133_v9 }
  0x20   :  { %89 = vst.msk [vmem:[#allocation2 + $0x1b8] sm:$0xff] %vm33_vm1, %v2133_v9  ;;  %90 = vst.msk [vmem:[#allocation2 + $0x1c0] sm:$0xff] %vm33_vm1, %v2133_v9 }
  0x21   :  { %91 = vst.msk [vmem:[#allocation2 + $0x1c8] sm:$0xff] %vm33_vm1, %v2133_v9  ;;  %92 = vst.msk [vmem:[#allocation2 + $0x1d0] sm:$0xff] %vm33_vm1, %v2133_v9 }
  0x22   :  { %93 = vst.msk [vmem:[#allocation2 + $0x1d8] sm:$0xff] %vm33_vm1, %v2133_v9  ;;  %94 = vst.msk [vmem:[#allocation2 + $0x1e0] sm:$0xff] %vm33_vm1, %v2133_v9 }
  0x23   :  { %95 = vst.msk [vmem:[#allocation2 + $0x1e8] sm:$0xff] %vm33_vm1, %v2133_v9  ;;  %96 = vst.msk [vmem:[#allocation2 + $0x1f0] sm:$0xff] %vm33_vm1, %v2133_v9 }
  0x24   :  { %97 = vst.msk [vmem:[#allocation2 + $0x1f8] sm:$0xff] %vm33_vm1, %v2133_v9 }
  0x25   :  { %14 = vsyncpa [#allocation5], 0  ;;  %1898 = vmatprep.mubr.msk.f32.mxu0 %vm230_vm0, %v170_v16  ;;  %v171_v17 = vld [vmem:[%s2821_s0 + $0x48] sm:$0xff]  ;;  %v172_v18 = vld [vmem:[%s2821_s0 + $0x50] sm:$0xff] }
  0x26   :  { %1899 = vmatmul.mubr.msk.f32.gmra.mrb[8].mxu0 %vm230_vm0, %v171_v17  ;;  %v173_v19 = vld [vmem:[%s2821_s0 + $0x58] sm:$0xff]  ;;  %v174_v20 = vld [vmem:[%s2821_s0 + $0x60] sm:$0xff]  ;;  %v175_v21 = vld [vmem:[%s2821_s0 + $0x68] sm:$0xff] }
  0x27   :  { %1901 = vmatprep.mubr.msk.f32.mxu0 %vm230_vm0, %v172_v18  ;;  %v176_v22 = vld [vmem:[%s2821_s0 + $0x70] sm:$0xff]  ;;  %v177_v23 = vld [vmem:[%s2821_s0 + $0x78] sm:$0xff]  ;;  %v178_v24 = vld [vmem:[%s2821_s0 + $0x80] sm:$0xff] }
  0x28   :  { %v179_v25 = vld [vmem:[%s2821_s0 + $0x88] sm:$0xff]  ;;  %v180_v26 = vld [vmem:[%s2821_s0 + $0x90] sm:$0xff]  ;;  %v181_v27 = vld [vmem:[%s2821_s0 + $0x98] sm:$0xff] }
  0x29   :  { %v182_v28 = vld [vmem:[%s2821_s0 + $0xa0] sm:$0xff]  ;;  %v183_v29 = vld [vmem:[%s2821_s0 + $0xa8] sm:$0xff]  ;;  %v184_v30 = vld [vmem:[%s2821_s0 + $0xb0] sm:$0xff] }
  0x2a   :  { %1902 = vmatmul.mubr.msk.f32.gmra.mrb[10].mxu0 %vm230_vm0, %v173_v19  ;;  %v185_v31 = vld [vmem:[%s2821_s0 + $0xb8] sm:$0xff]  ;;  %v186_v32 = vld [vmem:[%s2821_s0 + $0xc0] sm:$0xff]  ;;  %v187_v33 = vld [vmem:[%s2821_s0 + $0xc8] sm:$0xff] }
  0x2b   :  { %1904 = vmatprep.mubr.msk.f32.mxu0 %vm230_vm0, %v174_v20  ;;  %v188_v34 = vld [vmem:[%s2821_s0 + $0xd0] sm:$0xff]  ;;  %v189_v35 = vld [vmem:[%s2821_s0 + $0xd8] sm:$0xff]  ;;  %v190_v36 = vld [vmem:[%s2821_s0 + $0xe0] sm:$0xff] }
  0x2c   :  { %v191_v37 = vld [vmem:[%s2821_s0 + $0xe8] sm:$0xff]  ;;  %v192_v38 = vld [vmem:[%s2821_s0 + $0xf0] sm:$0xff]  ;;  %v193_v39 = vld [vmem:[%s2821_s0 + $0xf8] sm:$0xff] }
  0x2d   :  { %v194_v40 = vld [vmem:[%s2821_s0 + $0x100] sm:$0xff]  ;;  %v195_v41 = vld [vmem:[%s2821_s0 + $0x108] sm:$0xff]  ;;  %v196_v42 = vld [vmem:[%s2821_s0 + $0x110] sm:$0xff] }
  0x2e   :  { %1905 = vmatmul.mubr.msk.f32.gmra.mrb[12].mxu0 %vm230_vm0, %v175_v21  ;;  %v197_v43 = vld [vmem:[%s2821_s0 + $0x118] sm:$0xff]  ;;  %v198_v44 = vld [vmem:[%s2821_s0 + $0x120] sm:$0xff]  ;;  %v199_v45 = vld [vmem:[%s2821_s0 + $0x128] sm:$0xff] }
  0x2f   :  { %1907 = vmatprep.mubr.msk.f32.mxu0 %vm230_vm0, %v176_v22  ;;  %v200_v46 = vld [vmem:[%s2821_s0 + $0x130] sm:$0xff]  ;;  %v201_v47 = vld [vmem:[%s2821_s0 + $0x138] sm:$0xff]  ;;  %v202_v48 = vld [vmem:[%s2821_s0 + $0x140] sm:$0xff] }
  0x30   :  { %v203_v49 = vld [vmem:[%s2821_s0 + $0x148] sm:$0xff]  ;;  %v204_v50 = vld [vmem:[%s2821_s0 + $0x150] sm:$0xff]  ;;  %v205_v51 = vld [vmem:[%s2821_s0 + $0x158] sm:$0xff] }
  0x31   :  { %v206_v52 = vld [vmem:[%s2821_s0 + $0x160] sm:$0xff]  ;;  %v207_v53 = vld [vmem:[%s2821_s0 + $0x168] sm:$0xff]  ;;  %v208_v54 = vld [vmem:[%s2821_s0 + $0x170] sm:$0xff] }
  0x32   :  { %1908 = vmatmul.mubr.msk.f32.gmra.mrb[14].mxu0 %vm230_vm0, %v177_v23  ;;  %v209_v55 = vld [vmem:[%s2821_s0 + $0x178] sm:$0xff]  ;;  %v210_v56 = vld [vmem:[%s2821_s0 + $0x180] sm:$0xff]  ;;  %v211_v57 = vld [vmem:[%s2821_s0 + $0x188] sm:$0xff] }
  0x33   :  { %1910 = vmatprep.mubr.msk.f32.mxu0 %vm230_vm0, %v178_v24  ;;  %v212_v58 = vld [vmem:[%s2821_s0 + $0x190] sm:$0xff]  ;;  %v213_v59 = vld [vmem:[%s2821_s0 + $0x198] sm:$0xff]  ;;  %v214_v60 = vld [vmem:[%s2821_s0 + $0x1a0] sm:$0xff] }
  0x34   :  { %v215_v61 = vld [vmem:[%s2821_s0 + $0x1a8] sm:$0xff]  ;;  %v216_v62 = vld [vmem:[%s2821_s0 + $0x1b0] sm:$0xff]  ;;  %v217_v63 = vld [vmem:[%s2821_s0 + $0x1b8] sm:$0xff] }
  0x35   :  { %v218_v0 = vld [vmem:[%s2821_s0 + $0x1c0] sm:$0xff]  ;;  %v219_v1 = vld [vmem:[%s2821_s0 + $0x1c8] sm:$0xff]  ;;  %v220_v2 = vld [vmem:[%s2821_s0 + $0x1d0] sm:$0xff] }
  0x36   :  { %1911 = vmatmul.mubr.msk.f32.gmra.mrb[16].mxu0 %vm230_vm0, %v179_v25  ;;  %v221_v3 = vld [vmem:[%s2821_s0 + $0x1d8] sm:$0xff]  ;;  %v222_v4 = vld [vmem:[%s2821_s0 + $0x1e0] sm:$0xff]  ;;  %v223_v5 = vld [vmem:[%s2821_s0 + $0x1e8] sm:$0xff] }
  0x37   :  { %1913 = vmatprep.mubr.msk.f32.mxu0 %vm230_vm0, %v180_v26  ;;  %v224_v6 = vld [vmem:[%s2821_s0 + $0x1f0] sm:$0xff]  ;;  %v225_v7 = vld [vmem:[%s2821_s0 + $0x1f8] sm:$0xff]  ;;  %v2582_v8 = vld [vmem:[%s2824_s3] sm:$0xff] }
  0x38   :  { %1842 = vmatprep.mubr.msk.f32.mxu1 %vm33_vm1, %v2582_v8  ;;  %v99_v9 = vld [vmem:[#allocation2 + $0x8] sm:$0xff]  ;;  %v98_v10 = vld [vmem:[#allocation2] sm:$0xff]  ;;  %v101_v15 = vld [vmem:[#allocation2 + $0x18] sm:$0xff] }
  0x39   :  { %v100_v16 = vld [vmem:[#allocation2 + $0x10] sm:$0xff]  ;;  %v103_v21 = vld [vmem:[#allocation2 + $0x28] sm:$0xff]  ;;  %v102_v22 = vld [vmem:[#allocation2 + $0x20] sm:$0xff] }
  0x3a   :  { %1914 = vmatmul.mubr.msk.f32.gmra.mrb[18].mxu0 %vm230_vm0, %v181_v27  ;;  %v105_v27 = vld [vmem:[#allocation2 + $0x38] sm:$0xff]  ;;  %vm2620_vm2 = vmpackc.low %vm33_vm1, %vm33_vm1 }
  0x3b   :  { %1916 = vmatprep.mubr.msk.f32.mxu0 %vm230_vm0, %v182_v28  ;;  %v104_v28 = vld [vmem:[#allocation2 + $0x30] sm:$0xff] }
  0x3e   :  { %1917 = vmatmul.mubr.msk.f32.gmra.mrb[20].mxu0 %vm230_vm0, %v183_v29 }
  0x3f   :  { %1919 = vmatprep.mubr.msk.f32.mxu0 %vm230_vm0, %v184_v30 }
  0x42   :  { %1920 = vmatmul.mubr.msk.f32.gmra.mrb[22].mxu0 %vm230_vm0, %v185_v31 }
  0x43   :  { %1922 = vmatprep.mubr.msk.f32.mxu0 %vm230_vm0, %v186_v32 }
  0x46   :  { %1923 = vmatmul.mubr.msk.f32.gmra.mrb[24].mxu0 %vm230_vm0, %v187_v33  ;;  %v107_v33 = vld [vmem:[#allocation2 + $0x48] sm:$0xff] }
  0x47   :  { %1925 = vmatprep.mubr.msk.f32.mxu0 %vm230_vm0, %v188_v34  ;;  %v106_v34 = vld [vmem:[#allocation2 + $0x40] sm:$0xff] }
  0x4a   :  { %1926 = vmatmul.mubr.msk.f32.gmra.mrb[26].mxu0 %vm230_vm0, %v189_v35 }
  0x4b   :  { %1928 = vmatprep.mubr.msk.f32.mxu0 %vm230_vm0, %v190_v36 }
  0x4e   :  { %1929 = vmatmul.mubr.msk.f32.gmra.mrb[28].mxu0 %vm230_vm0, %v191_v37 }
  0x4f   :  { %1931 = vmatprep.mubr.msk.f32.mxu0 %vm230_vm0, %v192_v38 }
  0x52   :  { %1932 = vmatmul.mubr.msk.f32.gmra.mrb[30].mxu0 %vm230_vm0, %v193_v39  ;;  %v109_v39 = vld [vmem:[#allocation2 + $0x58] sm:$0xff] }
  0x53   :  { %1934 = vmatprep.mubr.msk.f32.mxu0 %vm230_vm0, %v194_v40  ;;  %v108_v40 = vld [vmem:[#allocation2 + $0x50] sm:$0xff] }
  0x56   :  { %1935 = vmatmul.mubr.msk.f32.gmra.mrb[32].mxu0 %vm230_vm0, %v195_v41 }
  0x57   :  { %1937 = vmatprep.mubr.msk.f32.mxu0 %vm230_vm0, %v196_v42 }
  0x5a   :  { %1938 = vmatmul.mubr.msk.f32.gmra.mrb[34].mxu0 %vm230_vm0, %v197_v43 }
  0x5b   :  { %1940 = vmatprep.mubr.msk.f32.mxu0 %vm230_vm0, %v198_v44 }
  0x5e   :  { %1941 = vmatmul.mubr.msk.f32.gmra.mrb[36].mxu0 %vm230_vm0, %v199_v45  ;;  %v111_v45 = vld [vmem:[#allocation2 + $0x68] sm:$0xff] }
  0x5f   :  { %1943 = vmatprep.mubr.msk.f32.mxu0 %vm230_vm0, %v200_v46  ;;  %v110_v46 = vld [vmem:[#allocation2 + $0x60] sm:$0xff] }
  0x62   :  { %1944 = vmatmul.mubr.msk.f32.gmra.mrb[38].mxu0 %vm230_vm0, %v201_v47 }
  0x63   :  { %1946 = vmatprep.mubr.msk.f32.mxu0 %vm230_vm0, %v202_v48 }
  0x66   :  { %1947 = vmatmul.mubr.msk.f32.gmra.mrb[40].mxu0 %vm230_vm0, %v203_v49 }
  0x67   :  { %1949 = vmatprep.mubr.msk.f32.mxu0 %vm230_vm0, %v204_v50 }
  0x6a   :  { %1950 = vmatmul.mubr.msk.f32.gmra.mrb[42].mxu0 %vm230_vm0, %v205_v51  ;;  %v113_v51 = vld [vmem:[#allocation2 + $0x78] sm:$0xff] }
  0x6b   :  { %1952 = vmatprep.mubr.msk.f32.mxu0 %vm230_vm0, %v206_v52  ;;  %v112_v52 = vld [vmem:[#allocation2 + $0x70] sm:$0xff] }
  0x6e   :  { %1953 = vmatmul.mubr.msk.f32.gmra.mrb[44].mxu0 %vm230_vm0, %v207_v53 }
  0x6f   :  { %1955 = vmatprep.mubr.msk.f32.mxu0 %vm230_vm0, %v208_v54 }
  0x72   :  { %1956 = vmatmul.mubr.msk.f32.gmra.mrb[46].mxu0 %vm230_vm0, %v209_v55 }
  0x73   :  { %1958 = vmatprep.mubr.msk.f32.mxu0 %vm230_vm0, %v210_v56 }
  0x76   :  { %1959 = vmatmul.mubr.msk.f32.gmra.mrb[48].mxu0 %vm230_vm0, %v211_v57  ;;  %v115_v57 = vld [vmem:[#allocation2 + $0x88] sm:$0xff] }
  0x77   :  { %1961 = vmatprep.mubr.msk.f32.mxu0 %vm230_vm0, %v212_v58  ;;  %v114_v58 = vld [vmem:[#allocation2 + $0x80] sm:$0xff] }
  0x7a   :  { %1962 = vmatmul.mubr.msk.f32.gmra.mrb[50].mxu0 %vm230_vm0, %v213_v59 }
  0x7b   :  { %1964 = vmatprep.mubr.msk.f32.mxu0 %vm230_vm0, %v214_v60 }
  0x7e   :  { %1965 = vmatmul.mubr.msk.f32.gmra.mrb[52].mxu0 %vm230_vm0, %v215_v61 }
  0x7f   :  { %1967 = vmatprep.mubr.msk.f32.mxu0 %vm230_vm0, %v216_v62 }
  0x82   :  { %1968 = vmatmul.mubr.msk.f32.gmra.mrb[54].mxu0 %vm230_vm0, %v217_v63  ;;  %v117_v63 = vld [vmem:[#allocation2 + $0x98] sm:$0xff] }
  0x83   :  { %1970 = vmatprep.mubr.msk.f32.mxu0 %vm230_vm0, %v218_v0  ;;  %v116_v0 = vld [vmem:[#allocation2 + $0x90] sm:$0xff] }
  0x86   :  { %1971 = vmatmul.mubr.msk.f32.gmra.mrb[56].mxu0 %vm230_vm0, %v219_v1 }
  0x87   :  { %1973 = vmatprep.mubr.msk.f32.mxu0 %vm230_vm0, %v220_v2 }
  0x8a   :  { %1974 = vmatmul.mubr.msk.f32.gmra.mrb[58].mxu0 %vm230_vm0, %v221_v3 }
  0x8b   :  { %1976 = vmatprep.mubr.msk.f32.mxu0 %vm230_vm0, %v222_v4  ;;  %v2607_v4 = vld [vmem:[%s2823_s2] ss:$0 sm:$0xff] }
  0x8e   :  { %1977 = vmatmul.mubr.msk.f32.gmra.mrb[60].mxu0 %vm230_vm0, %v223_v5 }
  0x8f   :  { %1979 = vmatprep.mubr.msk.f32.mxu0 %vm230_vm0, %v224_v6  ;;  %v119_v6 = vld [vmem:[#allocation2 + $0xa8] sm:$0xff] }
  0x92   :  { %1980 = vmatmul.mubr.msk.f32.gmra.mrb[62].mxu0 %vm230_vm0, %v225_v7 }
  0xe1   :  { %v1888_v11 = vpop.f32.mrb[0].mxu0 }
  0xe2   :  { %v809_v12 = vadd.f32 %v1888_v11, %v99_v9  ;;  %v489_v13 = vpop.f32.mrb[1].mxu0 }
  0xe3   :  { %v808_v14 = vadd.f32 %v489_v13, %v98_v10  ;;  %v118_v10 = vld [vmem:[#allocation2 + $0xa0] sm:$0xff] }
  0xe4   :  { %874 = vst.msk [vmem:[#allocation2 + $0x8] sm:$0xff] %vm33_vm1, %v809_v12 }
  0xe5   :  { %873 = vst.msk [vmem:[#allocation2] sm:$0xff] %vm33_vm1, %v808_v14  ;;  %v1891_v17 = vpop.f32.mrb[2].mxu0 }
  0xe6   :  { %v811_v18 = vadd.f32 %v1891_v17, %v101_v15  ;;  %v499_v19 = vpop.f32.mrb[3].mxu0  ;;  %v121_v17 = vld [vmem:[#allocation2 + $0xb8] sm:$0xff] }
  0xe7   :  { %v810_v20 = vadd.f32 %v499_v19, %v100_v16  ;;  %v120_v19 = vld [vmem:[#allocation2 + $0xb0] sm:$0xff] }
  0xe8   :  { %876 = vst.msk [vmem:[#allocation2 + $0x18] sm:$0xff] %vm33_vm1, %v811_v18 }
  0xe9   :  { %875 = vst.msk [vmem:[#allocation2 + $0x10] sm:$0xff] %vm33_vm1, %v810_v20  ;;  %v1894_v23 = vpop.f32.mrb[4].mxu0 }
  0xea   :  { %v813_v24 = vadd.f32 %v1894_v23, %v103_v21  ;;  %v509_v25 = vpop.f32.mrb[5].mxu0 }
  0xeb   :  { %v812_v26 = vadd.f32 %v509_v25, %v102_v22  ;;  %v941_v9 = vld [vmem:[#allocation2 + $0x8] sm:$0xff] }
  0xec   :  { %878 = vst.msk [vmem:[#allocation2 + $0x28] sm:$0xff] %vm33_vm1, %v813_v24  ;;  %v940_v7 = vld [vmem:[#allocation2] sm:$0xff]  ;;  %v1012_v15 = vadd.f32 %v2607_v4, %v941_v9 }
  0xed   :  { %877 = vst.msk [vmem:[#allocation2 + $0x20] sm:$0xff] %vm33_vm1, %v812_v26  ;;  %v1897_v29 = vpop.f32.mrb[6].mxu0  ;;  %v1011_v14 = vadd.f32 %v2607_v4, %v940_v7 }
  0xee   :  { %v815_v30 = vadd.f32 %v1897_v29, %v105_v27  ;;  %v519_v31 = vpop.f32.mrb[7].mxu0 }
  0xef   :  { %v814_v32 = vadd.f32 %v519_v31, %v104_v28  ;;  %v1075_v27 = vmax.f32 %v1011_v14, 0.0  ;;  %v1076_v28 = vmax.f32 %v1012_v15, 0.0  ;;  %v943_v29 = vld [vmem:[#allocation2 + $0x18] sm:$0xff]  ;;  %v123_v31 = vld [vmem:[#allocation2 + $0xc8] sm:$0xff] }
  0xf0   :  { %880 = vst.msk [vmem:[#allocation2 + $0x38] sm:$0xff] %vm33_vm1, %v815_v30 }
  0xf1   :  { %879 = vst.msk [vmem:[#allocation2 + $0x30] sm:$0xff] %vm33_vm1, %v814_v32 }
  0xf3   :  { %v945_v9 = vld [vmem:[#allocation2 + $0x28] sm:$0xff] }
  0xf4   :  { %v944_v7 = vld [vmem:[#allocation2 + $0x20] sm:$0xff] }
  0xf9   :  { %v1900_v35 = vpop.f32.mrb[8].mxu0 }
  0xfa   :  { %v817_v36 = vadd.f32 %v1900_v35, %v107_v33  ;;  %v529_v37 = vpop.f32.mrb[9].mxu0  ;;  %v122_v35 = vld [vmem:[#allocation2 + $0xc0] sm:$0xff] }
  0xfb   :  { %v816_v38 = vadd.f32 %v529_v37, %v106_v34  ;;  %v942_v34 = vld [vmem:[#allocation2 + $0x10] sm:$0xff] }
  0xfc   :  { %882 = vst.msk [vmem:[#allocation2 + $0x48] sm:$0xff] %vm33_vm1, %v817_v36 }
  0xfd   :  { %881 = vst.msk [vmem:[#allocation2 + $0x40] sm:$0xff] %vm33_vm1, %v816_v38  ;;  %v1903_v41 = vpop.f32.mrb[10].mxu0 }
  0xfe   :  { %v819_v42 = vadd.f32 %v1903_v41, %v109_v39  ;;  %v539_v43 = vpop.f32.mrb[11].mxu0 }
  0xff   :  { %v818_v44 = vadd.f32 %v539_v43, %v108_v40 }
 0x100   :  { %884 = vst.msk [vmem:[#allocation2 + $0x58] sm:$0xff] %vm33_vm1, %v819_v42  ;;  %v1014_v42 = vadd.f32 %v2607_v4, %v943_v29 }
 0x101   :  { %883 = vst.msk [vmem:[#allocation2 + $0x50] sm:$0xff] %vm33_vm1, %v818_v44  ;;  %v1906_v47 = vpop.f32.mrb[12].mxu0 }
 0x102   :  { %v821_v48 = vadd.f32 %v1906_v47, %v111_v45  ;;  %v549_v49 = vpop.f32.mrb[13].mxu0  ;;  %v1993_v45 = vpack.c.bf16 %v1076_v28, %v1075_v27  ;;  %v1013_v47 = vadd.f32 %v2607_v4, %v942_v34  ;;  %v946_v34 = vld [vmem:[#allocation2 + $0x30] sm:$0xff] }
 0x103   :  { %v820_v50 = vadd.f32 %v549_v49, %v110_v46  ;;  %v125_v49 = vld [vmem:[#allocation2 + $0xd8] sm:$0xff] }
 0x104   :  { %886 = vst.msk [vmem:[#allocation2 + $0x68] sm:$0xff] %vm33_vm1, %v821_v48 }
 0x105   :  { %885 = vst.msk [vmem:[#allocation2 + $0x60] sm:$0xff] %vm33_vm1, %v820_v50  ;;  %v1909_v53 = vpop.f32.mrb[14].mxu0 }
 0x106   :  { %v823_v54 = vadd.f32 %v1909_v53, %v113_v51  ;;  %v559_v55 = vpop.f32.mrb[15].mxu0  ;;  %v124_v53 = vld [vmem:[#allocation2 + $0xd0] sm:$0xff] }
 0x107   :  { %v822_v56 = vadd.f32 %v559_v55, %v112_v52  ;;  %v1140_v52 = vld [vmem:[%s2825_s4] sm:$0xff] }
 0x108   :  { %888 = vst.msk [vmem:[#allocation2 + $0x78] sm:$0xff] %vm33_vm1, %v823_v54 }
 0x109   :  { %887 = vst.msk [vmem:[#allocation2 + $0x70] sm:$0xff] %vm33_vm1, %v822_v56  ;;  %v1912_v59 = vpop.f32.mrb[16].mxu0  ;;  %v2134_v56 = vmov 0  }
 0x10a   :  { %v825_v60 = vadd.f32 %v1912_v59, %v115_v57  ;;  %v569_v61 = vpop.f32.mrb[17].mxu0  ;;  %2090 = vset.pattern.permute.xlu0 %v2134_v56  ;;  %v1521_v57 = vld [vmem:[#allocation3] sm:$0x1]  ;;  %2091 = vset.pattern.permute.xlu1 %v2134_v56 }
 0x10b   :  { %v824_v62 = vadd.f32 %v569_v61, %v114_v58  ;;  %1143 = vperm.xlu0 %2090, %v1140_v52   ;;  %1524 = vperm.xlu1 %2091, %v1521_v57  }
 0x10c   :  { %890 = vst.msk [vmem:[#allocation2 + $0x88] sm:$0xff] %vm33_vm1, %v825_v60 }
 0x10d   :  { %889 = vst.msk [vmem:[#allocation2 + $0x80] sm:$0xff] %vm33_vm1, %v824_v62  ;;  %v1915_v1 = vpop.f32.mrb[18].mxu0 }
 0x10e   :  { %v827_v2 = vadd.f32 %v1915_v1, %v117_v63  ;;  %v579_v3 = vpop.f32.mrb[19].mxu0  ;;  %v1077_v63 = vmax.f32 %v1013_v47, 0.0  ;;  %v1487_v1 = vld [vmem:[%s2826_s5] sm:$0xff]  ;;  %v133_v47 = vld [vmem:[#allocation2 + $0x118] sm:$0xff] }
 0x10f   :  { %v826_v5 = vadd.f32 %v579_v3, %v116_v0  ;;  %v1078_v0 = vmax.f32 %v1014_v42, 0.0  ;;  %v127_v3 = vld [vmem:[#allocation2 + $0xe8] sm:$0xff]  ;;  %1490 = vperm.xlu0 %2090, %v1487_v1  }
 0x110   :  { %892 = vst.msk [vmem:[#allocation2 + $0x98] sm:$0xff] %vm33_vm1, %v827_v2 }
 0x111   :  { %891 = vst.msk [vmem:[#allocation2 + $0x90] sm:$0xff] %vm33_vm1, %v826_v5  ;;  %v1918_v11 = vpop.f32.mrb[20].mxu0 }
 0x112   :  { %v829_v12 = vadd.f32 %v1918_v11, %v119_v6  ;;  %v589_v13 = vpop.f32.mrb[21].mxu0 }
 0x113   :  { %v828_v16 = vadd.f32 %v589_v13, %v118_v10  ;;  %v957_v18 = vld [vmem:[#allocation2 + $0x88] sm:$0xff]  ;;  %v126_v10 = vld [vmem:[#allocation2 + $0xe0] sm:$0xff] }
 0x114   :  { %894 = vst.msk [vmem:[#allocation2 + $0xa8] sm:$0xff] %vm33_vm1, %v829_v12  ;;  %v956_v20 = vld [vmem:[#allocation2 + $0x80] sm:$0xff]  ;;  %v1028_v21 = vadd.f32 %v2607_v4, %v957_v18  ;;  %v1016_v18 = vadd.f32 %v2607_v4, %v945_v9 }
 0x115   :  { %893 = vst.msk [vmem:[#allocation2 + $0xa0] sm:$0xff] %vm33_vm1, %v828_v16  ;;  %v1921_v22 = vpop.f32.mrb[22].mxu0  ;;  %v1027_v23 = vadd.f32 %v2607_v4, %v956_v20  ;;  %v1999_v16 = vpack.c.bf16 %v1078_v0, %v1077_v63  ;;  %v129_v20 = vld [vmem:[#allocation2 + $0xf8] sm:$0xff]  ;;  %v134_v63 = vld [vmem:[#allocation2 + $0x120] sm:$0xff] }
 0x116   :  { %v831_v24 = vadd.f32 %v1921_v22, %v121_v17  ;;  %v599_v25 = vpop.f32.mrb[23].mxu0  ;;  %v1092_v26 = vmax.f32 %v1028_v21, 0.0  ;;  %v1015_v17 = vadd.f32 %v2607_v4, %v944_v7  ;;  %v1080_v29 = vmax.f32 %v1016_v18, 0.0 }
 0x117   :  { %v830_v30 = vadd.f32 %v599_v25, %v120_v19  ;;  %v1091_v32 = vmax.f32 %v1027_v23, 0.0  ;;  %v959_v33 = vld [vmem:[#allocation2 + $0x98] sm:$0xff] }
 0x118   :  { %896 = vst.msk [vmem:[#allocation2 + $0xb8] sm:$0xff] %vm33_vm1, %v831_v24  ;;  %v958_v37 = vld [vmem:[#allocation2 + $0x90] sm:$0xff]  ;;  %v1030_v38 = vadd.f32 %v2607_v4, %v959_v33  ;;  %v1079_v28 = vmax.f32 %v1015_v17, 0.0 }
 0x119   :  { %895 = vst.msk [vmem:[#allocation2 + $0xb0] sm:$0xff] %vm33_vm1, %v830_v30  ;;  %v1924_v39 = vpop.f32.mrb[24].mxu0  ;;  %v1990_v40 = vpack.c.bf16 %v1092_v26, %v1091_v32  ;;  %v1029_v41 = vadd.f32 %v2607_v4, %v958_v37  ;;  %v128_v24 = vld [vmem:[#allocation2 + $0xf0] sm:$0xff]  ;;  %v130_v37 = vld [vmem:[#allocation2 + $0x100] sm:$0xff] }
 0x11a   :  { %v833_v43 = vadd.f32 %v1924_v39, %v123_v31  ;;  %v609_v44 = vpop.f32.mrb[25].mxu0  ;;  %v1094_v46 = vmax.f32 %v1030_v38, 0.0  ;;  %v131_v31 = vld [vmem:[#allocation2 + $0x108] sm:$0xff] }
 0x11b   :  { %v832_v48 = vadd.f32 %v609_v44, %v122_v35  ;;  %1992 = vmatprep.subr.msk.bf16.mxu1 %vm2620_vm2, %v1990_v40  ;;  %v1093_v50 = vmax.f32 %v1029_v41, 0.0  ;;  %v961_v51 = vld [vmem:[#allocation2 + $0xa8] sm:$0xff]  ;;  %v947_v35 = vld [vmem:[#allocation2 + $0x38] sm:$0xff]  ;;  %v1017_v44 = vadd.f32 %v2607_v4, %v946_v34 }
 0x11c   :  { %898 = vst.msk [vmem:[#allocation2 + $0xc8] sm:$0xff] %vm33_vm1, %v833_v43  ;;  %1995 = vmatpush3.bf16.xpose.msk.msra.mxu1 %vm2620_vm2, %v1993_v45  ;;  %v960_v54 = vld [vmem:[#allocation2 + $0xa0] sm:$0xff]  ;;  %v1032_v55 = vadd.f32 %v2607_v4, %v961_v51  ;;  %v2005_v43 = vpack.c.bf16 %v1080_v29, %v1079_v28  ;;  %v1018_v45 = vadd.f32 %v2607_v4, %v947_v35  ;;  %v132_v51 = vld [vmem:[#allocation2 + $0x110] sm:$0xff] }
 0x11d   :  { %897 = vst.msk [vmem:[#allocation2 + $0xc0] sm:$0xff] %vm33_vm1, %v832_v48  ;;  %v1927_v58 = vpop.f32.mrb[26].mxu0  ;;  %v1996_v59 = vpack.c.bf16 %v1094_v46, %v1093_v50  ;;  %v1031_v60 = vadd.f32 %v2607_v4, %v960_v54 }
 0x11e   :  { %v835_v61 = vadd.f32 %v1927_v58, %v125_v49  ;;  %v619_v62 = vpop.f32.mrb[27].mxu0  ;;  %v1096_v6 = vmax.f32 %v1032_v55, 0.0  ;;  %v1081_v55 = vmax.f32 %v1017_v44, 0.0  ;;  %v1082_v56 = vmax.f32 %v1018_v45, 0.0  ;;  %v135_v58 = vld [vmem:[#allocation2 + $0x128] sm:$0xff] }
 0x11f   :  { %v834_v2 = vadd.f32 %v619_v62, %v124_v53  ;;  %1998 = vmatprep.subr.msk.bf16.mxu1 %vm2620_vm2, %v1996_v59  ;;  %v1095_v5 = vmax.f32 %v1031_v60, 0.0  ;;  %v963_v12 = vld [vmem:[#allocation2 + $0xb8] sm:$0xff]  ;;  %v949_v62 = vld [vmem:[#allocation2 + $0x48] sm:$0xff] }
 0x120   :  { %900 = vst.msk [vmem:[#allocation2 + $0xd8] sm:$0xff] %vm33_vm1, %v835_v61  ;;  %v962_v11 = vld [vmem:[#allocation2 + $0xb0] sm:$0xff]  ;;  %v1034_v23 = vadd.f32 %v2607_v4, %v963_v12  ;;  %v948_v61 = vld [vmem:[#allocation2 + $0x40] sm:$0xff]  ;;  %v1020_v9 = vadd.f32 %v2607_v4, %v949_v62 }
 0x121   :  { %899 = vst.msk [vmem:[#allocation2 + $0xd0] sm:$0xff] %vm33_vm1, %v834_v2  ;;  %v1930_v13 = vpop.f32.mrb[28].mxu0  ;;  %v2002_v21 = vpack.c.bf16 %v1096_v6, %v1095_v5  ;;  %v1033_v22 = vadd.f32 %v2607_v4, %v962_v11  ;;  %v2011_v6 = vpack.c.bf16 %v1082_v56, %v1081_v55  ;;  %v1019_v7 = vadd.f32 %v2607_v4, %v948_v61  ;;  %v137_v11 = vld [vmem:[#allocation2 + $0x138] sm:$0xff] }
 0x122   :  { %v837_v14 = vadd.f32 %v1930_v13, %v127_v3  ;;  %v629_v15 = vpop.f32.mrb[29].mxu0  ;;  %v1098_v33 = vmax.f32 %v1034_v23, 0.0 }
 0x123   :  { %v836_v19 = vadd.f32 %v629_v15, %v126_v10  ;;  %v1097_v32 = vmax.f32 %v1033_v22, 0.0  ;;  %v965_v39 = vld [vmem:[#allocation2 + $0xc8] sm:$0xff]  ;;  %v136_v15 = vld [vmem:[#allocation2 + $0x130] sm:$0xff] }
 0x124   :  { %902 = vst.msk [vmem:[#allocation2 + $0xe8] sm:$0xff] %vm33_vm1, %v837_v14  ;;  %2001 = vmatpush3.bf16.xpose.msk.msra.mxu1 %vm2620_vm2, %v1999_v16  ;;  %v964_v38 = vld [vmem:[#allocation2 + $0xc0] sm:$0xff]  ;;  %v1036_v50 = vadd.f32 %v2607_v4, %v965_v39  ;;  %v139_v22 = vld [vmem:[#allocation2 + $0x148] sm:$0xff] }
 0x125   :  { %901 = vst.msk [vmem:[#allocation2 + $0xe0] sm:$0xff] %vm33_vm1, %v836_v19  ;;  %v1933_v25 = vpop.f32.mrb[30].mxu0  ;;  %2004 = vmatprep.subr.msk.bf16.mxu1 %vm2620_vm2, %v2002_v21  ;;  %v2008_v48 = vpack.c.bf16 %v1098_v33, %v1097_v32  ;;  %v1035_v49 = vadd.f32 %v2607_v4, %v964_v38  ;;  %v1083_v19 = vmax.f32 %v1019_v7, 0.0  ;;  %v141_v38 = vld [vmem:[#allocation2 + $0x158] sm:$0xff] }
 0x126   :  { %v839_v26 = vadd.f32 %v1933_v25, %v129_v20  ;;  %v639_v27 = vpop.f32.mrb[31].mxu0  ;;  %v1100_v60 = vmax.f32 %v1036_v50, 0.0  ;;  %v1084_v20 = vmax.f32 %v1020_v9, 0.0  ;;  %v950_v25 = vld [vmem:[#allocation2 + $0x50] sm:$0xff] }
 0x127   :  { %v838_v30 = vadd.f32 %v639_v27, %v128_v24  ;;  %v1099_v59 = vmax.f32 %v1035_v49, 0.0  ;;  %v967_v1 = vld [vmem:[#allocation2 + $0xd8] sm:$0xff]  ;;  %v138_v27 = vld [vmem:[#allocation2 + $0x140] sm:$0xff]  ;;  %v1021_v34 = vadd.f32 %v2607_v4, %v950_v25  ;;  %v143_v49 = vld [vmem:[#allocation2 + $0x168] sm:$0xff] }
 0x128   :  { %904 = vst.msk [vmem:[#allocation2 + $0xf8] sm:$0xff] %vm33_vm1, %v839_v26  ;;  %v966_v0 = vld [vmem:[#allocation2 + $0xd0] sm:$0xff]  ;;  %v1038_v14 = vadd.f32 %v2607_v4, %v967_v1  ;;  %v951_v26 = vld [vmem:[#allocation2 + $0x58] sm:$0xff]  ;;  %v2017_v33 = vpack.c.bf16 %v1084_v20, %v1083_v19 }
 0x129   :  { %903 = vst.msk [vmem:[#allocation2 + $0xf0] sm:$0xff] %vm33_vm1, %v838_v30  ;;  %v1936_v40 = vpop.f32.mrb[32].mxu0  ;;  %v2014_v12 = vpack.c.bf16 %v1100_v60, %v1099_v59  ;;  %v1037_v13 = vadd.f32 %v2607_v4, %v966_v0  ;;  %v1022_v35 = vadd.f32 %v2607_v4, %v951_v26  ;;  %v145_v0 = vld [vmem:[#allocation2 + $0x178] sm:$0xff] }
 0x12a   :  { %v841_v41 = vadd.f32 %v1936_v40, %v131_v31  ;;  %v649_v42 = vpop.f32.mrb[33].mxu0  ;;  %v1102_v24 = vmax.f32 %v1038_v14, 0.0 }
 0x12b   :  { %v840_v46 = vadd.f32 %v649_v42, %v130_v37  ;;  %v1101_v23 = vmax.f32 %v1037_v13, 0.0  ;;  %v969_v29 = vld [vmem:[#allocation2 + $0xe8] sm:$0xff]  ;;  %v140_v42 = vld [vmem:[#allocation2 + $0x150] sm:$0xff] }
 0x12c   :  { %906 = vst.msk [vmem:[#allocation2 + $0x108] sm:$0xff] %vm33_vm1, %v841_v41  ;;  %2007 = vmatpush3.bf16.xpose.msk.msra.mxu1 %vm2620_vm2, %v2005_v43  ;;  %v968_v28 = vld [vmem:[#allocation2 + $0xe0] sm:$0xff]  ;;  %v1040_v41 = vadd.f32 %v2607_v4, %v969_v29  ;;  %v147_v13 = vld [vmem:[#allocation2 + $0x188] sm:$0xff] }
 0x12d   :  { %905 = vst.msk [vmem:[#allocation2 + $0x100] sm:$0xff] %vm33_vm1, %v840_v46  ;;  %v1939_v52 = vpop.f32.mrb[34].mxu0  ;;  %2010 = vmatprep.subr.msk.bf16.mxu1 %vm2620_vm2, %v2008_v48  ;;  %v2020_v39 = vpack.c.bf16 %v1102_v24, %v1101_v23  ;;  %v1039_v40 = vadd.f32 %v2607_v4, %v968_v28  ;;  %v1085_v46 = vmax.f32 %v1021_v34, 0.0  ;;  %v148_v28 = vld [vmem:[#allocation2 + $0x190] sm:$0xff] }
 0x12e   :  { %v843_v53 = vadd.f32 %v1939_v52, %v133_v47  ;;  %v659_v54 = vpop.f32.mrb[35].mxu0  ;;  %v1086_v47 = vmax.f32 %v1022_v35, 0.0  ;;  %v952_v52 = vld [vmem:[#allocation2 + $0x60] sm:$0xff]  ;;  %v151_v35 = vld [vmem:[#allocation2 + $0x1a8] sm:$0xff] }
 0x12f   :  { %v842_v57 = vadd.f32 %v659_v54, %v132_v51  ;;  %v1103_v50 = vmax.f32 %v1039_v40, 0.0  ;;  %v1104_v51 = vmax.f32 %v1040_v41, 0.0  ;;  %v142_v54 = vld [vmem:[#allocation2 + $0x160] sm:$0xff]  ;;  %v971_v56 = vld [vmem:[#allocation2 + $0xf8] sm:$0xff]  ;;  %v1023_v61 = vadd.f32 %v2607_v4, %v952_v52 }
 0x130   :  { %908 = vst.msk [vmem:[#allocation2 + $0x118] sm:$0xff] %vm33_vm1, %v843_v53  ;;  %v953_v53 = vld [vmem:[#allocation2 + $0x68] sm:$0xff]  ;;  %v970_v55 = vld [vmem:[#allocation2 + $0xf0] sm:$0xff]  ;;  %v2023_v60 = vpack.c.bf16 %v1086_v47, %v1085_v46 }
 0x131   :  { %907 = vst.msk [vmem:[#allocation2 + $0x110] sm:$0xff] %vm33_vm1, %v842_v57  ;;  %v1942_v2 = vpop.f32.mrb[36].mxu0  ;;  %v1024_v62 = vadd.f32 %v2607_v4, %v953_v53  ;;  %v2026_v1 = vpack.c.bf16 %v1104_v51, %v1103_v50  ;;  %v152_v51 = vld [vmem:[#allocation2 + $0x1b0] sm:$0xff] }
 0x132   :  { %v845_v3 = vadd.f32 %v1942_v2, %v135_v58  ;;  %v669_v5 = vpop.f32.mrb[37].mxu0  ;;  %v1041_v2 = vadd.f32 %v2607_v4, %v970_v55 }
 0x133   :  { %v844_v10 = vadd.f32 %v669_v5, %v134_v63  ;;  %v144_v5 = vld [vmem:[#allocation2 + $0x170] sm:$0xff] }
 0x134   :  { %910 = vst.msk [vmem:[#allocation2 + $0x128] sm:$0xff] %vm33_vm1, %v845_v3  ;;  %2013 = vmatpush3.bf16.xpose.msk.msra.mxu1 %vm2620_vm2, %v2011_v6  ;;  %v1042_v3 = vadd.f32 %v2607_v4, %v971_v56  ;;  %v1105_v14 = vmax.f32 %v1041_v2, 0.0 }
 0x135   :  { %909 = vst.msk [vmem:[#allocation2 + $0x120] sm:$0xff] %vm33_vm1, %v844_v10  ;;  %v1945_v16 = vpop.f32.mrb[38].mxu0  ;;  %2016 = vmatprep.subr.msk.bf16.mxu1 %vm2620_vm2, %v2014_v12  ;;  %v1087_v10 = vmax.f32 %v1023_v61, 0.0 }
 0x136   :  { %v847_v17 = vadd.f32 %v1945_v16, %v137_v11  ;;  %v679_v18 = vpop.f32.mrb[39].mxu0  ;;  %v1088_v11 = vmax.f32 %v1024_v62, 0.0  ;;  %v954_v16 = vld [vmem:[#allocation2 + $0x70] sm:$0xff] }
 0x137   :  { %v846_v21 = vadd.f32 %v679_v18, %v136_v15  ;;  %v1106_v15 = vmax.f32 %v1042_v3, 0.0  ;;  %v146_v18 = vld [vmem:[#allocation2 + $0x180] sm:$0xff]  ;;  %v1025_v23 = vadd.f32 %v2607_v4, %v954_v16 }
 0x138   :  { %912 = vst.msk [vmem:[#allocation2 + $0x138] sm:$0xff] %vm33_vm1, %v847_v17  ;;  %v955_v17 = vld [vmem:[#allocation2 + $0x78] sm:$0xff]  ;;  %v154_v3 = vld [vmem:[#allocation2 + $0x1c0] sm:$0xff] }
 0x139   :  { %911 = vst.msk [vmem:[#allocation2 + $0x130] sm:$0xff] %vm33_vm1, %v846_v21  ;;  %v1948_v30 = vpop.f32.mrb[40].mxu0  ;;  %v1026_v24 = vadd.f32 %v2607_v4, %v955_v17  ;;  %v2032_v26 = vpack.c.bf16 %v1106_v15, %v1105_v14 }
 0x13a   :  { %v849_v31 = vadd.f32 %v1948_v30, %v139_v22  ;;  %v689_v32 = vpop.f32.mrb[41].mxu0  ;;  %v2029_v22 = vpack.c.bf16 %v1088_v11, %v1087_v10 }
 0x13b   :  { %v848_v37 = vadd.f32 %v689_v32, %v138_v27  ;;  %v149_v27 = vld [vmem:[#allocation2 + $0x198] sm:$0xff]  ;;  %v1089_v32 = vmax.f32 %v1025_v23, 0.0 }
 0x13c   :  { %914 = vst.msk [vmem:[#allocation2 + $0x148] sm:$0xff] %vm33_vm1, %v849_v31  ;;  %2019 = vmatpush3.bf16.xpose.msk.msra.mxu1 %vm2620_vm2, %v2017_v33  ;;  %v1090_v33 = vmax.f32 %v1026_v24, 0.0 }
 0x13d   :  { %913 = vst.msk [vmem:[#allocation2 + $0x140] sm:$0xff] %vm33_vm1, %v848_v37  ;;  %v1951_v43 = vpop.f32.mrb[42].mxu0  ;;  %2022 = vmatprep.subr.msk.bf16.mxu1 %vm2620_vm2, %v2020_v39  ;;  %v972_v37 = vld [vmem:[#allocation2 + $0x100] sm:$0xff] }
 0x13e   :  { %v851_v44 = vadd.f32 %v1951_v43, %v141_v38  ;;  %v699_v45 = vpop.f32.mrb[43].mxu0  ;;  %v973_v38 = vld [vmem:[#allocation2 + $0x108] sm:$0xff]  ;;  %v150_v39 = vld [vmem:[#allocation2 + $0x1a0] sm:$0xff]  ;;  %v2035_v41 = vpack.c.bf16 %v1090_v33, %v1089_v32 }
 0x13f   :  { %v850_v48 = vadd.f32 %v699_v45, %v140_v42  ;;  %v1044_v45 = vadd.f32 %v2607_v4, %v973_v38  ;;  %v976_v32 = vld [vmem:[#allocation2 + $0x120] sm:$0xff]  ;;  %v977_v33 = vld [vmem:[#allocation2 + $0x128] sm:$0xff] }
 0x140   :  { %916 = vst.msk [vmem:[#allocation2 + $0x158] sm:$0xff] %vm33_vm1, %v851_v44  ;;  %v1043_v44 = vadd.f32 %v2607_v4, %v972_v37  ;;  %v158_v37 = vld [vmem:[#allocation2 + $0x1e0] sm:$0xff] }
 0x141   :  { %915 = vst.msk [vmem:[#allocation2 + $0x150] sm:$0xff] %vm33_vm1, %v850_v48  ;;  %v1954_v57 = vpop.f32.mrb[44].mxu0  ;;  %v153_v48 = vld [vmem:[#allocation2 + $0x1b8] sm:$0xff]  ;;  %v1108_v56 = vmax.f32 %v1044_v45, 0.0 }
 0x142   :  { %v853_v58 = vadd.f32 %v1954_v57, %v143_v49  ;;  %v709_v59 = vpop.f32.mrb[45].mxu0  ;;  %v1107_v55 = vmax.f32 %v1043_v44, 0.0  ;;  %v1048_v44 = vadd.f32 %v2607_v4, %v977_v33 }
 0x143   :  { %v852_v63 = vadd.f32 %v709_v59, %v142_v54  ;;  %v975_v59 = vld [vmem:[#allocation2 + $0x118] sm:$0xff] }
 0x144   :  { %918 = vst.msk [vmem:[#allocation2 + $0x168] sm:$0xff] %vm33_vm1, %v853_v58  ;;  %2025 = vmatpush3.bf16.xpose.msk.msra.mxu1 %vm2620_vm2, %v2023_v60  ;;  %v2041_v10 = vpack.c.bf16 %v1108_v56, %v1107_v55 }
 0x145   :  { %917 = vst.msk [vmem:[#allocation2 + $0x160] sm:$0xff] %vm33_vm1, %v852_v63  ;;  %v1957_v6 = vpop.f32.mrb[46].mxu0  ;;  %2028 = vmatprep.subr.msk.bf16.mxu1 %vm2620_vm2, %v2026_v1  ;;  %v974_v63 = vld [vmem:[#allocation2 + $0x110] sm:$0xff] }
 0x146   :  { %v855_v7 = vadd.f32 %v1957_v6, %v145_v0  ;;  %v719_v9 = vpop.f32.mrb[47].mxu0  ;;  %v155_v0 = vld [vmem:[#allocation2 + $0x1c8] sm:$0xff] }
 0x147   :  { %v854_v12 = vadd.f32 %v719_v9, %v144_v5 }
 0x148   :  { %920 = vst.msk [vmem:[#allocation2 + $0x178] sm:$0xff] %vm33_vm1, %v855_v7  ;;  %v1046_v7 = vadd.f32 %v2607_v4, %v975_v59  ;;  %v978_v59 = vld [vmem:[#allocation2 + $0x130] sm:$0xff] }
 0x149   :  { %919 = vst.msk [vmem:[#allocation2 + $0x170] sm:$0xff] %vm33_vm1, %v854_v12  ;;  %v1960_v19 = vpop.f32.mrb[48].mxu0  ;;  %v1045_v12 = vadd.f32 %v2607_v4, %v974_v63 }
 0x14a   :  { %v857_v20 = vadd.f32 %v1960_v19, %v147_v13  ;;  %v729_v21 = vpop.f32.mrb[49].mxu0 }
 0x14b   :  { %v856_v25 = vadd.f32 %v729_v21, %v146_v18  ;;  %v157_v18 = vld [vmem:[#allocation2 + $0x1d8] sm:$0xff]  ;;  %v156_v21 = vld [vmem:[#allocation2 + $0x1d0] sm:$0xff] }
 0x14c   :  { %922 = vst.msk [vmem:[#allocation2 + $0x188] sm:$0xff] %vm33_vm1, %v857_v20  ;;  %2031 = vmatpush3.bf16.xpose.msk.msra.mxu1 %vm2620_vm2, %v2029_v22 }
 0x14d   :  { %921 = vst.msk [vmem:[#allocation2 + $0x180] sm:$0xff] %vm33_vm1, %v856_v25  ;;  %2034 = vmatprep.subr.msk.bf16.mxu1 %vm2620_vm2, %v2032_v26  ;;  %v1963_v29 = vpop.f32.mrb[50].mxu0  ;;  %v1109_v25 = vmax.f32 %v1045_v12, 0.0  ;;  %v1110_v26 = vmax.f32 %v1046_v7, 0.0  ;;  %v980_v12 = vld [vmem:[#allocation2 + $0x140] sm:$0xff] }
 0x14e   :  { %v859_v30 = vadd.f32 %v1963_v29, %v149_v27  ;;  %v739_v31 = vpop.f32.mrb[51].mxu0 }
 0x14f   :  { %v858_v34 = vadd.f32 %v739_v31, %v148_v28 }
 0x150   :  { %924 = vst.msk [vmem:[#allocation2 + $0x198] sm:$0xff] %vm33_vm1, %v859_v30  ;;  %v159_v30 = vld [vmem:[#allocation2 + $0x1e8] sm:$0xff] }
 0x151   :  { %923 = vst.msk [vmem:[#allocation2 + $0x190] sm:$0xff] %vm33_vm1, %v858_v34  ;;  %v1966_v40 = vpop.f32.mrb[52].mxu0 }
 0x152   :  { %v861_v42 = vadd.f32 %v1966_v40, %v151_v35  ;;  %v749_v43 = vpop.f32.mrb[53].mxu0 }
 0x153   :  { %v860_v46 = vadd.f32 %v749_v43, %v150_v39  ;;  %v989_v47 = vld [vmem:[#allocation2 + $0x188] sm:$0xff]  ;;  %v1047_v43 = vadd.f32 %v2607_v4, %v976_v32 }
 0x154   :  { %2037 = vmatpush3.bf16.xpose.msk.msra.mxu1 %vm2620_vm2, %v2035_v41  ;;  %926 = vst.msk [vmem:[#allocation2 + $0x1a8] sm:$0xff] %vm33_vm1, %v861_v42  ;;  %v988_v49 = vld [vmem:[#allocation2 + $0x180] sm:$0xff]  ;;  %v1060_v50 = vadd.f32 %v2607_v4, %v989_v47  ;;  %v2047_v42 = vpack.c.bf16 %v1110_v26, %v1109_v25  ;;  %v982_v26 = vld [vmem:[#allocation2 + $0x150] sm:$0xff] }
 0x155   :  { %925 = vst.msk [vmem:[#allocation2 + $0x1a0] sm:$0xff] %vm33_vm1, %v860_v46  ;;  %v1059_v52 = vadd.f32 %v2607_v4, %v988_v49  ;;  %v1969_v53 = vpop.f32.mrb[54].mxu0  ;;  %v160_v49 = vld [vmem:[#allocation2 + $0x1f0] sm:$0xff]  ;;  %v1053_v32 = vadd.f32 %v2607_v4, %v982_v26 }
 0x156   :  { %v1124_v54 = vmax.f32 %v1060_v50, 0.0  ;;  %v863_v57 = vadd.f32 %v1969_v53, %v153_v48  ;;  %v759_v58 = vpop.f32.mrb[55].mxu0  ;;  %v161_v48 = vld [vmem:[#allocation2 + $0x1f8] sm:$0xff]  ;;  %v1111_v53 = vmax.f32 %v1047_v43, 0.0 }
 0x157   :  { %v1123_v60 = vmax.f32 %v1059_v52, 0.0  ;;  %v862_v61 = vadd.f32 %v759_v58, %v152_v51  ;;  %v991_v62 = vld [vmem:[#allocation2 + $0x198] sm:$0xff] }
 0x158   :  { %928 = vst.msk [vmem:[#allocation2 + $0x1b8] sm:$0xff] %vm33_vm1, %v863_v57  ;;  %v990_v1 = vld [vmem:[#allocation2 + $0x190] sm:$0xff]  ;;  %v1062_v2 = vadd.f32 %v2607_v4, %v991_v62 }
 0x159   :  { %v2038_v5 = vpack.c.bf16 %v1124_v54, %v1123_v60  ;;  %927 = vst.msk [vmem:[#allocation2 + $0x1b0] sm:$0xff] %vm33_vm1, %v862_v61  ;;  %v1061_v6 = vadd.f32 %v2607_v4, %v990_v1  ;;  %v1972_v9 = vpop.f32.mrb[56].mxu0  ;;  %v1112_v54 = vmax.f32 %v1048_v44, 0.0  ;;  %v979_v60 = vld [vmem:[#allocation2 + $0x138] sm:$0xff] }
 0x15a   :  { %v1126_v11 = vmax.f32 %v1062_v2, 0.0  ;;  %v865_v13 = vadd.f32 %v1972_v9, %v155_v0  ;;  %v769_v14 = vpop.f32.mrb[57].mxu0  ;;  %v1049_v2 = vadd.f32 %v2607_v4, %v978_v59 }
 0x15b   :  { %1843 = vmatmul.mubr.msk.f32.vlgmr.msra.gmra.mrb[0].mxu1 %vm33_vm1, %v2582_v8  ;;  %2040 = vmatprep.subr.msk.bf16.mxu1 %vm2620_vm2, %v2038_v5  ;;  %v1125_v15 = vmax.f32 %v1061_v6, 0.0  ;;  %v864_v16 = vadd.f32 %v769_v14, %v154_v3  ;;  %v993_v17 = vld [vmem:[#allocation2 + $0x1a8] sm:$0xff]  ;;  %v2053_v1 = vpack.c.bf16 %v1112_v54, %v1111_v53  ;;  %v1050_v3 = vadd.f32 %v2607_v4, %v979_v60  ;;  %v987_v53 = vld [vmem:[#allocation2 + $0x178] sm:$0xff] }
 0x15c   :  { %2043 = vmatpush3.bf16.xpose.msk.msra.mxu1 %vm2620_vm2, %v2041_v10  ;;  %930 = vst.msk [vmem:[#allocation2 + $0x1c8] sm:$0xff] %vm33_vm1, %v865_v13  ;;  %v992_v19 = vld [vmem:[#allocation2 + $0x1a0] sm:$0xff]  ;;  %v1064_v20 = vadd.f32 %v2607_v4, %v993_v17  ;;  %1876 = vmatprep.mubr.msk.f32.mxu1 %vm33_vm1, %v2582_v8  ;;  %v1113_v7 = vmax.f32 %v1049_v2, 0.0  ;;  %v981_v13 = vld [vmem:[#allocation2 + $0x148] sm:$0xff] }
 0x15d   :  { %v2044_v22 = vpack.c.bf16 %v1126_v11, %v1125_v15  ;;  %929 = vst.msk [vmem:[#allocation2 + $0x1c0] sm:$0xff] %vm33_vm1, %v864_v16  ;;  %v1063_v23 = vadd.f32 %v2607_v4, %v992_v19  ;;  %v1975_v24 = vpop.f32.mrb[58].mxu0  ;;  %v1114_v9 = vmax.f32 %v1050_v3, 0.0  ;;  %v1052_v19 = vadd.f32 %v2607_v4, %v981_v13 }
 0x15e   :  { %v1128_v27 = vmax.f32 %v1064_v20, 0.0  ;;  %v867_v28 = vadd.f32 %v1975_v24, %v157_v18  ;;  %v779_v29 = vpop.f32.mrb[59].mxu0  ;;  %v1051_v18 = vadd.f32 %v2607_v4, %v980_v12 }
 0x15f   :  { %2046 = vmatprep.subr.msk.bf16.mxu1 %vm2620_vm2, %v2044_v22  ;;  %v1127_v31 = vmax.f32 %v1063_v23, 0.0  ;;  %v866_v34 = vadd.f32 %v779_v29, %v156_v21  ;;  %v995_v8 = vld [vmem:[#allocation2 + $0x1b8] sm:$0xff]  ;;  %v2059_v17 = vpack.c.bf16 %v1114_v9, %v1113_v7  ;;  %v1116_v23 = vmax.f32 %v1052_v19, 0.0 }
 0x160   :  { %932 = vst.msk [vmem:[#allocation2 + $0x1d8] sm:$0xff] %vm33_vm1, %v867_v28  ;;  %v994_v35 = vld [vmem:[#allocation2 + $0x1b0] sm:$0xff]  ;;  %v1066_v40 = vadd.f32 %v2607_v4, %v995_v8  ;;  %v1115_v22 = vmax.f32 %v1051_v18, 0.0 }
 0x161   :  { %v2050_v38 = vpack.c.bf16 %v1128_v27, %v1127_v31  ;;  %931 = vst.msk [vmem:[#allocation2 + $0x1d0] sm:$0xff] %vm33_vm1, %v866_v34  ;;  %v1065_v39 = vadd.f32 %v2607_v4, %v994_v35  ;;  %v1978_v41 = vpop.f32.mrb[60].mxu0  ;;  %v983_v27 = vld [vmem:[#allocation2 + $0x158] sm:$0xff]  ;;  %v1117_v35 = vmax.f32 %v1053_v32, 0.0 }
 0x162   :  { %v869_v45 = vadd.f32 %v1978_v41, %v159_v30  ;;  %v789_v46 = vpop.f32.mrb[61].mxu0  ;;  %v1130_v51 = vmax.f32 %v1066_v40, 0.0  ;;  %v2065_v31 = vpack.c.bf16 %v1116_v23, %v1115_v22  ;;  %v1054_v33 = vadd.f32 %v2607_v4, %v983_v27  ;;  %v984_v40 = vld [vmem:[#allocation2 + $0x160] sm:$0xff]  ;;  %v985_v41 = vld [vmem:[#allocation2 + $0x168] sm:$0xff] }
 0x163   :  { %v868_v47 = vadd.f32 %v789_v46, %v158_v37  ;;  %v1129_v50 = vmax.f32 %v1065_v39, 0.0  ;;  %v997_v56 = vld [vmem:[#allocation2 + $0x1c8] sm:$0xff]  ;;  %v1055_v46 = vadd.f32 %v2607_v4, %v984_v40 }
 0x164   :  { %2049 = vmatpush3.bf16.xpose.msk.msra.mxu1 %vm2620_vm2, %v2047_v42  ;;  %934 = vst.msk [vmem:[#allocation2 + $0x1e8] sm:$0xff] %vm33_vm1, %v869_v45  ;;  %v996_v55 = vld [vmem:[#allocation2 + $0x1c0] sm:$0xff]  ;;  %v1068_v0 = vadd.f32 %v2607_v4, %v997_v56  ;;  %v1118_v37 = vmax.f32 %v1054_v33, 0.0 }
 0x165   :  { %2052 = vmatprep.subr.msk.bf16.mxu1 %vm2620_vm2, %v2050_v38  ;;  %933 = vst.msk [vmem:[#allocation2 + $0x1e0] sm:$0xff] %vm33_vm1, %v868_v47  ;;  %v1981_v52 = vpop.f32.mrb[62].mxu0  ;;  %v2056_v62 = vpack.c.bf16 %v1130_v51, %v1129_v50  ;;  %v1067_v63 = vadd.f32 %v2607_v4, %v996_v55  ;;  %v1056_v47 = vadd.f32 %v2607_v4, %v985_v41  ;;  %v1119_v50 = vmax.f32 %v1055_v46, 0.0 }
 0x166   :  { %v871_v57 = vadd.f32 %v1981_v52, %v161_v48  ;;  %v799_v58 = vpop.f32.mrb[63].mxu0  ;;  %v1132_v6 = vmax.f32 %v1068_v0, 0.0  ;;  %v2071_v45 = vpack.c.bf16 %v1118_v37, %v1117_v35  ;;  %v986_v52 = vld [vmem:[#allocation2 + $0x170] sm:$0xff] }
 0x167   :  { %v870_v61 = vadd.f32 %v799_v58, %v160_v49  ;;  %v1131_v5 = vmax.f32 %v1067_v63, 0.0  ;;  %v999_v11 = vld [vmem:[#allocation2 + $0x1d8] sm:$0xff]  ;;  %v1120_v51 = vmax.f32 %v1056_v47, 0.0  ;;  %v1057_v56 = vadd.f32 %v2607_v4, %v986_v52 }
 0x168   :  { %936 = vst.msk [vmem:[#allocation2 + $0x1f8] sm:$0xff] %vm33_vm1, %v871_v57  ;;  %v998_v10 = vld [vmem:[#allocation2 + $0x1d0] sm:$0xff]  ;;  %v1070_v16 = vadd.f32 %v2607_v4, %v999_v11  ;;  %v1058_v57 = vadd.f32 %v2607_v4, %v987_v53 }
 0x169   :  { %935 = vst.msk [vmem:[#allocation2 + $0x1f0] sm:$0xff] %vm33_vm1, %v870_v61  ;;  %v2062_v14 = vpack.c.bf16 %v1132_v6, %v1131_v5  ;;  %v1069_v15 = vadd.f32 %v2607_v4, %v998_v10  ;;  %v2077_v55 = vpack.c.bf16 %v1120_v51, %v1119_v50  ;;  %v1121_v58 = vmax.f32 %v1057_v56, 0.0  ;;  %v2108_v61 = vld [vmem:[%s2824_s3] sm:$0xff]  ;;  %s2136_s3 = smov [#allocation4]  }
 0x16a   :  { %v1134_v21 = vmax.f32 %v1070_v16, 0.0  ;;  %v1122_v59 = vmax.f32 %v1058_v57, 0.0  ;;  %v1527_v5 = vlaneseq  ;;  %s1599_s18 = sshll.u32 %s2136_s3, 4  ;;  %s1600_s18 = int_to_ptr.vmem [resolvable:$true] %s1599_s18 }
 0x16b   :  { %v1133_v20 = vmax.f32 %v1069_v15, 0.0  ;;  %v1001_v25 = vld [vmem:[#allocation2 + $0x1e8] sm:$0xff]  ;;  %s2109_s19 = scalar_lea.vmem %s1600_s18, 64  ;;  %p2114_p1 = scmp.lt.s32.totalorder %s1600_s18, %s1600_s18 }
 0x16c   :  { %2055 = vmatpush3.bf16.xpose.msk.msra.mxu1 %vm2620_vm2, %v2053_v1  ;;  %v1000_v24 = vld [vmem:[#allocation2 + $0x1e0] sm:$0xff]  ;;  %v1072_v30 = vadd.f32 %v2607_v4, %v1001_v25  ;;  %v2083_v60 = vpack.c.bf16 %v1122_v59, %v1121_v58  ;;  %v2804_v36 = vshrl.u32 %v1527_v5, 7  ;;  %vm1590_vm3 = vcmp.lt.s32.totalorder %v1527_v5, 512  ;;  %p2110_p0 = scmp.ne.s32.totalorder %s1600_s18, %s2109_s19  ;;  %p2115_p2 = scmp.lt.s32.totalorder %s2109_s19, %s2109_s19 }
 0x16d   :  { %2058 = vmatprep.subr.msk.bf16.mxu1 %vm2620_vm2, %v2056_v62  ;;  %v2068_v28 = vpack.c.bf16 %v1134_v21, %v1133_v20  ;;  %v1071_v29 = vadd.f32 %v2607_v4, %v1000_v24 }
 0x16e   :  { %v1136_v8 = vmax.f32 %v1072_v30, 0.0  ;;  %v1529_v15 = vsub.s32 0, %v2804_v36  ;;  %p2116_p3 = por %p2115_p2, %p2114_p1 }
 0x16f   :  { %v1135_v34 = vmax.f32 %v1071_v29, 0.0  ;;  %v1003_v39 = vld [vmem:[#allocation2 + $0x1f8] sm:$0xff] }
 0x170   :  { %v1002_v38 = vld [vmem:[#allocation2 + $0x1f0] sm:$0xff]  ;;  %v1074_v44 = vadd.f32 %v2607_v4, %v1003_v39  ;;  %p2117_p4 = pnand %p2116_p3, %p2110_p0 }
 0x171   :  { %v2074_v42 = vpack.c.bf16 %v1136_v8, %v1135_v34  ;;  %v1073_v43 = vadd.f32 %v2607_v4, %v1002_v38 }
 0x172   :  { %v1138_v49 = vmax.f32 %v1074_v44, 0.0 }
 0x173   :  { %v1137_v48 = vmax.f32 %v1073_v43, 0.0 }
 0x174   :  { %2061 = vmatpush3.bf16.xpose.msk.msra.mxu1 %vm2620_vm2, %v2059_v17 }
 0x175   :  { %2064 = vmatprep.subr.msk.bf16.mxu1 %vm2620_vm2, %v2062_v14  ;;  %v2080_v54 = vpack.c.bf16 %v1138_v49, %v1137_v48 }
 0x17c   :  { %2067 = vmatpush3.bf16.xpose.msk.msra.mxu1 %vm2620_vm2, %v2065_v31 }
 0x17d   :  { %2070 = vmatprep.subr.msk.bf16.mxu1 %vm2620_vm2, %v2068_v28 }
 0x184   :  { %2073 = vmatpush3.bf16.xpose.msk.msra.mxu1 %vm2620_vm2, %v2071_v45 }
 0x185   :  { %2076 = vmatprep.subr.msk.bf16.mxu1 %vm2620_vm2, %v2074_v42 }
 0x18a   :  { %v1144_v62 = vpop.permute.xlu0 %1143  ;;  %v1525_v17 = vpop.permute.xlu1 %1524 }
 0x18b   :  { %v1530_v21 = vrot.slane %v1525_v17, %v1529_v15 }
 0x18c   :  { %2079 = vmatpush3.bf16.xpose.msk.msra.mxu1 %vm2620_vm2, %v2077_v55 }
 0x18d   :  { %2082 = vmatprep.subr.msk.bf16.mxu1 %vm2620_vm2, %v2080_v54 }
 0x18e   :  { %v1491_v2 = vpop.permute.xlu0 %1490 }
 0x194   :  { %2085 = vmatpush3.bf16.xpose.msk.msra.mxu1 %vm2620_vm2, %v2083_v60 }
 0x19b   :  { %1877 = vmatmul.mubr.msk.f32.vlgmr.msra.gmra.mrb[2].mxu1 %vm33_vm1, %v2108_v61 }
 0x22e   :  { %v1407_v4 = vpop.f32.mrb[0].mxu1 }
 0x22f   :  { %v1408_v63 = vadd.f32 %v1407_v4, %v1144_v62  ;;  %v1409_v0 = vpop.f32.mrb[1].mxu1 }
 0x230   :  { %v1410_v1 = vadd.f32 %v1409_v0, %v1144_v62 }
 0x231   :  { %v1483_v3 = vmax.f32 %v1408_v63, 0.0  ;;  %v2135_v63 = vmov 1966171168  }
 0x232   :  { %v1484_v6 = vmax.f32 %v1410_v1, 0.0  ;;  %v1566_v0 = vunpack.c.l.s4 %v2135_v63 }
 0x233   :  { %v1493_v7 = vmul.f32 %v1491_v2, %v1483_v3 }
 0x234   :  { %v1494_v9 = vmul.f32 %v1491_v2, %v1484_v6  ;;  %v1567_v1 = vunpack.c.0.s8 %v1566_v0 }
 0x235   :  { %v1497_v10 = vrot.slane %v1493_v7, 4 }
 0x236   :  { %v1503_v11 = vrot.slane %v1494_v9, 4  ;;  %v1570_v3 = vsub.s32 %v1567_v1, %v2804_v36 }
 0x237   :  { %v1498_v12 = vadd.f32 %v1497_v10, %v1493_v7 }
 0x238   :  { %v1504_v13 = vadd.f32 %v1503_v11, %v1494_v9 }
 0x239   :  { %v1499_v14 = vrot.slane %v1498_v12, 2 }
 0x23a   :  { %v1505_v16 = vrot.slane %v1504_v13, 2 }
 0x23b   :  { %v1500_v18 = vadd.f32 %v1499_v14, %v1498_v12 }
 0x23c   :  { %v1506_v19 = vadd.f32 %v1505_v16, %v1504_v13 }
 0x23d   :  { %v1501_v20 = vrot.slane %v1500_v18, 1 }
 0x23e   :  { %v1507_v22 = vrot.slane %v1506_v19, 1 }
 0x23f   :  { %v1502_v23 = vadd.f32 %v1501_v20, %v1500_v18 }
 0x240   :  { %v1508_v24 = vadd.f32 %v1507_v22, %v1506_v19 }
 0x241   :  { %v1531_v25 = vadd.f32 %v1530_v21, %v1502_v23 }
 0x242   :  { %v1532_v26 = vadd.f32 %v1530_v21, %v1508_v24 }
 0x243   :  { %v1738_v27 = vmul.f32 -1.442695, %v1531_v25 }
 0x244   :  { %v1739_v28 = vmul.f32 -1.442695, %v1532_v26 }
 0x245   :  { %2092 = vpow2.f32 %v1738_v27 }
 0x246   :  { %2094 = vpow2.f32 %v1739_v28 }
 0x24f   :  { %v2093_v29 = vpop.eup %2092 }
 0x250   :  { %v2095_v30 = vpop.eup %2094  ;;  %v1547_v31 = vadd.f32 1.0, %v2093_v29 }
 0x251   :  { %v1548_v32 = vadd.f32 1.0, %v2095_v30 }
 0x252   :  { %2096 = vrcp.f32 %v1547_v31 }
 0x253   :  { %2098 = vrcp.f32 %v1548_v32 }
 0x25c   :  { %v2097_v33 = vpop.eup %2096 }
 0x25d   :  { %v2099_v34 = vpop.eup %2098 }
 0x25e   :  { %v1563_v8 = vcombine.low %v2097_v33, %v2099_v34 }
 0x260   :  { %v1571_v9 = vrot.slane %v1563_v8, %v1570_v3 }
 0x26e   :  { %v1478_v35 = vpop.f32.mrb[2].mxu1 }
 0x26f   :  { %v1479_v37 = vadd.f32 %v1478_v35, %v1144_v62  ;;  %v1480_v38 = vpop.f32.mrb[3].mxu1 }
 0x270   :  { %v1481_v39 = vadd.f32 %v1480_v38, %v1144_v62 }
 0x271   :  { %v1485_v40 = vmax.f32 %v1479_v37, 0.0 }
 0x272   :  { %v1486_v41 = vmax.f32 %v1481_v39, 0.0 }
 0x273   :  { %v1495_v42 = vmul.f32 %v1491_v2, %v1485_v40 }
 0x274   :  { %v1496_v43 = vmul.f32 %v1491_v2, %v1486_v41 }
 0x275   :  { %v1509_v44 = vrot.slane %v1495_v42, 4 }
 0x276   :  { %v1515_v45 = vrot.slane %v1496_v43, 4 }
 0x277   :  { %v1510_v46 = vadd.f32 %v1509_v44, %v1495_v42 }
 0x278   :  { %v1516_v47 = vadd.f32 %v1515_v45, %v1496_v43 }
 0x279   :  { %v1511_v48 = vrot.slane %v1510_v46, 2 }
 0x27a   :  { %v1517_v49 = vrot.slane %v1516_v47, 2 }
 0x27b   :  { %v1512_v50 = vadd.f32 %v1511_v48, %v1510_v46 }
 0x27c   :  { %v1518_v51 = vadd.f32 %v1517_v49, %v1516_v47 }
 0x27d   :  { %v1513_v52 = vrot.slane %v1512_v50, 1 }
 0x27e   :  { %v1519_v53 = vrot.slane %v1518_v51, 1 }
 0x27f   :  { %v1514_v54 = vadd.f32 %v1513_v52, %v1512_v50 }
 0x280   :  { %v1520_v55 = vadd.f32 %v1519_v53, %v1518_v51 }
 0x281   :  { %v1533_v56 = vadd.f32 %v1530_v21, %v1514_v54 }
 0x282   :  { %v1534_v57 = vadd.f32 %v1530_v21, %v1520_v55 }
 0x283   :  { %v1740_v58 = vmul.f32 -1.442695, %v1533_v56 }
 0x284   :  { %v1741_v59 = vmul.f32 -1.442695, %v1534_v57 }
 0x285   :  { %2100 = vpow2.f32 %v1740_v58 }
 0x286   :  { %2102 = vpow2.f32 %v1741_v59 }
 0x28f   :  { %v2101_v60 = vpop.eup %2100 }
 0x290   :  { %v2103_v61 = vpop.eup %2102  ;;  %v1549_v62 = vadd.f32 1.0, %v2101_v60 }
 0x291   :  { %v1550_v4 = vadd.f32 1.0, %v2103_v61 }
 0x292   :  { %2104 = vrcp.f32 %v1549_v62 }
 0x293   :  { %2106 = vrcp.f32 %v1550_v4 }
 0x29c   :  { %v2105_v2 = vpop.eup %2104 }
 0x29d   :  { %v2107_v6 = vpop.eup %2106 }
 0x29e   :  { %v1564_v7 = vcombine.low %v2105_v2, %v2107_v6 }
 0x2a0   :  { %v1578_v10 = vrot.slane %v1564_v7, %v1570_v3 }
 0x2a2   :  { %v1579_v11 = vcombine.low %v1571_v9, %v1578_v10 }
 0x2a4   :  { %v1586_v12 = vrot.slane %v1579_v11, %v1570_v3 }
 0x2a6   :  { %1592 = vst.msk [vmem:[#allocation4] sm:$0xf] %vm1590_vm3, %v1586_v12 }
 0x2a7   :  { %2120 = shalt.err (!%p2117_p4)
}
 0x2a8   :  { %s2121_s22 = scalar_lea.hbm %s2828_s7, 64 }
 0x2a9   :  { %p2122_p5 = scmp.ne.s32.totalorder %s2828_s7, %s2121_s22  ;;  %p2125_p6 = scmp.lt.u32.totalorder %s2121_s22, %s2828_s7 }
 0x2ab   :  { %p2127_p7 = pnand %p2125_p6, %p2122_p5 }
 0x2ad   :  { %2130 = shalt.err (!%p2127_p7)
}
 0x2ae   :  { %1602 = dma.vmem_to_hbm [thread:$0]  %s1600_s18, 64, %s2828_s7, [#allocation5]  }
 0x2af   :  { %2131 = dma.done.wait [#allocation5], 64  }
 0x2b0   :  { %2132 = vsyncadd [#allocation5], 4294967232 }
 0x2b1   :  { %1606 = vsyncpa [#allocation5], 1 }

</bundles_post_ra>
